<compile_context>
chip_gen: v7x
topology: tpu7x:2x2x1
jax: 0.10.0
libtpu: 0.0.40
codegen_flags: <defaults>
</compile_context>

<pallas_src>
import functools

import numpy as np
import jax
import jax.numpy as jnp
from jax.experimental import pallas as pl
from jax.experimental.pallas import tpu as pltpu


def max_dwt_level(input_len, filter_len=2):
    # Same formula as the PyTorch module (copied from PyWavelets).
    return int(np.floor(np.log2(input_len / (filter_len - 1))))


def _haar_level_matrix(L, length):
    """(L, L) float64 matrix applying one Haar DWT level to the first `length`
    columns (c coefficients then d coefficients, each length//2), identity on
    the untouched tail."""
    r = 1.0 / np.sqrt(2.0)
    M = np.eye(L, dtype=np.float64)
    M[:length, :length] = 0.0
    half = length // 2
    for i in range(half):
        M[2 * i, i] = r            # c_i = (x[2i] + x[2i+1]) / sqrt(2)
        M[2 * i + 1, i] = r
        M[2 * i, half + i] = r     # d_i = (x[2i] - x[2i+1]) / sqrt(2)
        M[2 * i + 1, half + i] = -r
    return M


@functools.lru_cache(maxsize=None)
def _composed_haar_matrix(L, level, g):
    """(g*L, g*L) f32 device array: kron(eye(g), M_0 @ M_1 @ ... @ M_{level-1}).
    Cached per (L, level, g) so repeated calls don't recompose / re-upload."""
    M = np.eye(L, dtype=np.float64)
    for l in range(level):
        M = M @ _haar_level_matrix(L, L >> l)
    if g > 1:
        M = np.kron(np.eye(g, dtype=np.float64), M)
    return jnp.asarray(M.astype(np.float32))


def _haar_dwt_kernel(x_ref, m_ref, o_ref):
    # x_ref: (rt, lanes_in)  rows of the (packed) input, native dtype (pipelined).
    # m_ref: (lanes_in, lanes_out) composed Haar matrix — either whole-resident in
    #        VMEM or a pipelined column tile.
    # o_ref: (rt, lanes_out) output tile (lane-dense).
    x = x_ref[...].astype(jnp.float32)           # in-kernel cast; no-op for f32 input
    o_ref[...] = jnp.dot(
        x, m_ref[...],
        preferred_element_type=jnp.float32,
        precision=jax.lax.Precision.HIGHEST,     # keep full-f32 MXU passes
    ).astype(o_ref.dtype)


def _round_up(x, m):
    return ((x + m - 1) // m) * m


def _tpu_info():
    """(vmem_capacity_bytes, num_tensorcores) with conservative fallbacks."""
    vmem_cap = 64 * 1024 * 1024          # v7x-safe fallback (smallest VMEM per TC)
    num_cores = 1                        # v5e/v6e-safe fallback (1 TC per chip)
    try:
        info = pltpu.get_tpu_info()
        vmem_cap = int(getattr(info, "vmem_capacity_bytes", vmem_cap))
        for name in ("num_cores", "core_count", "num_tensorcores",
                     "tensorcore_count", "num_cores_per_chip"):
            v = getattr(info, name, None)
            if isinstance(v, int) and v > 0:
                num_cores = v
                break
    except Exception:
        pass
    return vmem_cap, num_cores


def _pick_row_tile(n_rows, lanes_in, lanes_out, fixed_bytes, vmem_cap, num_cores):
    """Largest row tile whose double-buffered in/out slabs plus the fixed-resident
    bytes fit comfortably in VMEM; capped at 512 (~85% of HBM roofline)."""
    budget = int(vmem_cap * 0.6) - fixed_bytes
    per_row = 2 * (lanes_in + lanes_out) * 4     # double-buffered in + out, f32 worst case
    rt = budget // max(per_row, 1)
    rt = min(rt, 512)
    if num_cores >= 2 and n_rows >= 8:
        # Only multi-TC chips (v7x) benefit from >= ~4 balanced grid steps; on a
        # single-TC v5e/v6e this would needlessly halve moderate-N tiles.
        rt = min(rt, max(128, _round_up(-(-n_rows // 4), 8)))
    rt = max(rt, 8)
    if rt >= 128:
        rt = (rt // 128) * 128                   # fill MXU rows
    return rt


def _clamp_row_tile(rt, n_rows):
    """Honor the (8, 128) block constraint: block rows divisible by 8, or a single
    block equal to the full row extent; never larger than the array itself."""
    if n_rows < 8:
        return n_rows
    rt = min(rt, (n_rows // 8) * 8)
    return max(8, (rt // 8) * 8)


def haar_dwt(x, level=None, row_tile=None, col_tile=None):
    """Pallas equivalent of HaarDWT.forward for x of shape (batch, width, L)."""
    B, W, L = x.shape
    if not (L & (L - 1) == 0 and L != 0):
        raise ValueError("Input array length {} is not power of 2".format(L))
    max_lvl = max_dwt_level(L)
    if level is None:
        level = max_lvl
    if level > max_lvl:
        raise ValueError(
            "Input array length {} gives max DWT level {}".format(L, max_lvl))
    if level == 0:
        return x

    N = B * W

    # Lane packing: for small L put g rows side by side along the lane axis so
    # every block's last dim is a lane-dense multiple of 128 (256 lanes also fill
    # the 2x256 MXU on v6e/v7x; neutral on v5e for this memory-bound kernel).
    g = max(1, 256 // L) if L <= 128 else 1
    Lp = g * L

    # Deterministic "parameters": the Haar analysis filters (c_filter / d_filter of
    # the module) baked into ONE composed, kron-packed step matrix.
    M = _composed_haar_matrix(L, level, g)

    xf = x.reshape(N, L)
    if g > 1:
        Np = _round_up(N, g)
        if Np != N:
            # Zero pad rows only affect their own block-diagonal group; sliced off below.
            xf = jnp.pad(xf, ((0, Np - N), (0, 0)))
        xp = xf.reshape(Np // g, Lp)
        n_rows = Np // g
    else:
        Np = N
        xp = xf
        n_rows = N

    vmem_cap, num_cores = _tpu_info()
    m_bytes = Lp * Lp * 4

    # Whole-matrix-resident path for small/medium L; column-tiled path when the
    # composed matrix would eat too much VMEM (mandatory on v7x at L=4096).
    use_col_tiling = (col_tile is not None) or (m_bytes >= vmem_cap // 8)

    if not use_col_tiling:
        rt = row_tile if row_tile is not None else _pick_row_tile(
            n_rows, Lp, Lp, m_bytes, vmem_cap, num_cores)
        rt = _clamp_row_tile(rt, n_rows)
        grid = (pl.cdiv(n_rows, rt),)
        in_specs = [
            pl.BlockSpec((rt, Lp), lambda i: (i, 0)),
            # Whole composed matrix resident once in VMEM for the entire call
            # (not routed through the double-buffered pipeline).
            pl.BlockSpec(memory_space=pltpu.MemorySpace.VMEM),
        ]
        out_specs = pl.BlockSpec((rt, Lp), lambda i: (i, 0))
        dim_sem = ("parallel",)
        vmem_need = 2 * 2 * rt * Lp * 4 + m_bytes
    else:
        tn = col_tile if col_tile is not None else min(512, Lp)
        tn = min(Lp, max(128, (tn // 128) * 128))
        fixed = 2 * Lp * tn * 4                      # double-buffered M column tile
        rt = row_tile if row_tile is not None else _pick_row_tile(
            n_rows, Lp, tn, fixed, vmem_cap, num_cores)
        rt = _clamp_row_tile(rt, n_rows)
        # Column axis is innermost: the x row tile keeps the same block index across
        # it, so it is fetched once per row tile (no re-DMA of the input).
        grid = (pl.cdiv(n_rows, rt), pl.cdiv(Lp, tn))
        in_specs = [
            pl.BlockSpec((rt, Lp), lambda i, j: (i, 0)),
            pl.BlockSpec((Lp, tn), lambda i, j: (0, j)),
        ]
        out_specs = pl.BlockSpec((rt, tn), lambda i, j: (i, j))
        dim_sem = ("parallel", "parallel")
        vmem_need = 2 * rt * Lp * 4 + 2 * rt * tn * 4 + fixed

    vmem_limit = int(min(vmem_cap * 0.9, max(vmem_need + (8 << 20), 32 << 20)))

    out = pl.pallas_call(
        _haar_dwt_kernel,
        out_shape=jax.ShapeDtypeStruct((n_rows, Lp), x.dtype),
        grid_spec=pltpu.PrefetchScalarGridSpec(
            num_scalar_prefetch=0,
            grid=grid,
            in_specs=in_specs,
            out_specs=out_specs,
        ),
        compiler_params=pltpu.CompilerParams(
            dimension_semantics=dim_sem,
            vmem_limit_bytes=vmem_limit,
        ),
    )(xp, M)

    if g > 1:
        out = out.reshape(Np, L)[:N]
    return out.reshape(B, W, L)


def haar_dwt_ref(x, level):
    """Pure-numpy reference mirroring the PyTorch forward exactly (per-level f32)."""
    x = np.array(x, dtype=np.float32)
    r = np.float32(1.0 / np.sqrt(2.0))
    L = x.shape[-1]
    for l in range(level):
        n = L >> l
        xin = x[..., :n]
        c = (xin[..., 0::2] + xin[..., 1::2]) * r
        d = (xin[..., 0::2] - xin[..., 1::2]) * r
        x = x.copy()
        x[..., :n] = np.concatenate([c, d], axis=-1)
    return x


# NOTE: the module's ReplicationPad1d `padder` is never used in forward() (input_len
# is constrained to a power of 2), so it is intentionally omitted.

if __name__ == "__main__":
    key = jax.random.PRNGKey(0)

    # 1) Module's convention (batch, width, input_len) — lane-packed path
    #    (L=16 -> g=16, 256-lane blocks), default level = max_dwt_level = 4.
    batch, width, input_len = 2, 4, 16
    x = jax.random.normal(key, (batch, width, input_len), dtype=jnp.float32)
    y = jax.block_until_ready(haar_dwt(x))
    ref = haar_dwt_ref(np.asarray(x), max_dwt_level(input_len))
    assert y.shape == (batch, width, input_len)
    np.testing.assert_allclose(np.asarray(y), ref, atol=1e-5, rtol=1e-5)

    # 2) Packed path with row padding (N=15 not a multiple of g=8).
    x2 = jax.random.normal(jax.random.PRNGKey(1), (3, 5, 32), dtype=jnp.float32)
    y2 = jax.block_until_ready(haar_dwt(x2, level=3))
    ref2 = haar_dwt_ref(np.asarray(x2), 3)
    np.testing.assert_allclose(np.asarray(y2), ref2, atol=1e-5, rtol=1e-5)

    # 3) Unpacked whole-matrix-resident path (L=512 >= 256, no packing).
    x3 = jax.random.normal(jax.random.PRNGKey(2), (4, 4, 512), dtype=jnp.float32)
    y3 = jax.block_until_ready(haar_dwt(x3, level=3))
    ref3 = haar_dwt_ref(np.asarray(x3), 3)
    np.testing.assert_allclose(np.asarray(y3), ref3, atol=1e-5, rtol=1e-5)

    # 4) Column-tiled (2-D grid) path, forced at small shapes so it is exercised.
    x4 = jax.random.normal(jax.random.PRNGKey(3), (2, 4, 256), dtype=jnp.float32)
    y4 = jax.block_until_ready(haar_dwt(x4, level=4, col_tile=128))
    ref4 = haar_dwt_ref(np.asarray(x4), 4)
    np.testing.assert_allclose(np.asarray(y4), ref4, atol=1e-5, rtol=1e-5)

    print("KERNEL_OK")
</pallas_src>

<mosaic_0001>
module attributes {stable_mosaic.version = 11 : i64} {
  func.func @_haar_dwt_kernel(%arg0: i32, %arg1: memref<1x256xf32, #tpu.memory_space<vmem>>, %arg2: memref<256x256xf32, #tpu.memory_space<vmem>>, %arg3: memref<1x256xf32, #tpu.memory_space<vmem>>) attributes {dimension_semantics = [#tpu.dimension_semantics<parallel>], iteration_bounds = array<i64: 1>, scalar_prefetch = 0 : i64, scratch_operands = 0 : i64, tpu.core_type = #tpu.core_type<tc>, window_params = [{transform_indices = @transform_0, window_bounds = array<i64: 1, 256>}, {pipeline_mode = #tpu.pipeline_mode<synchronous>, transform_indices = @transform_1, window_bounds = array<i64: 256, 256>}, {transform_indices = @transform_2, window_bounds = array<i64: 1, 256>}]} {
    %c0 = arith.constant 0 : index
    %c0_0 = arith.constant 0 : index
    %0 = vector.load %arg1[%c0, %c0_0] : memref<1x256xf32, #tpu.memory_space<vmem>>, vector<1x256xf32>
    %c0_1 = arith.constant 0 : index
    %c0_2 = arith.constant 0 : index
    %1 = vector.load %arg2[%c0_1, %c0_2] : memref<256x256xf32, #tpu.memory_space<vmem>>, vector<256x256xf32>
    %cst = arith.constant dense<0.000000e+00> : vector<1x256xf32>
    %2 = tpu.matmul %0, %1, %cst {dimension_numbers = #tpu.dot_dimension_numbers<[1], [0], [0], [1], [0, 0, 1, 1], [], []>, precision = #tpu.contract_precision<fp32>} : vector<1x256xf32>, vector<256x256xf32>, vector<1x256xf32> -> vector<1x256xf32>
    %c0_3 = arith.constant 0 : index
    %c0_4 = arith.constant 0 : index
    %3 = vector.load %arg3[%c0_3, %c0_4] : memref<1x256xf32, #tpu.memory_space<vmem>>, vector<1x256xf32>
    tpu.vector_store %arg3[%c0_3, %c0_4], %2 {strides = array<i32>} : memref<1x256xf32, #tpu.memory_space<vmem>>, vector<1x256xf32>,
    return
  }
  func.func @transform_0(%arg0: i32) -> (i32, i32) {
    %c0_i32 = arith.constant 0 : i32
    %c0_i32_0 = arith.constant 0 : i32
    return %arg0, %c0_i32 : i32, i32
  }
  func.func @transform_1(%arg0: i32) -> (i32, i32) {
    %c0_i32 = arith.constant 0 : i32
    %c0_i32_0 = arith.constant 0 : i32
    %c0_i32_1 = arith.constant 0 : i32
    return %c0_i32, %c0_i32_0 : i32, i32
  }
  func.func @transform_2(%arg0: i32) -> (i32, i32) {
    %c0_i32 = arith.constant 0 : i32
    %c0_i32_0 = arith.constant 0 : i32
    return %arg0, %c0_i32 : i32, i32
  }
}

</mosaic_0001>

<bundles_post_ra>
// kernel: tpu_custom_call.1
= control target key start
LH: loop header
LB: loop body
LE: loop exit
PB: predicated region body
PF: predicated region fallthrough
CT: control target
= control target key end

     0   :  { %7 = vsyncpa [#allocation3], 0  ;;  %s2707_s0 = inlined_call_operand.hbm [shape: f32[1,256], index: 0, kind: input, shape index: {}]   ;;  %s2708_s1 = inlined_call_operand.hbm [shape: f32[256,256], index: 1, kind: input, shape index: {}]   ;;  %s2709_s2 = inlined_call_operand.hbm [shape: f32[1,256], index: 2, kind: output, shape index: {}]  }
   0x1   :  { %8 = vsyncpa [#allocation6], 0 }
   0x2   :  { %9 = vsyncpa [#allocation4], 0  ;;  %s1909_s9 = smov [#allocation2]   ;;  %s1910_s11 = smov [#allocation5]  }
   0x3   :  { %s16_s10 = sshll.u32 %s1909_s9, 4  ;;  %s25_s12 = sshll.u32 %s1910_s11, 4  ;;  %s17_s10 = int_to_ptr.vmem [resolvable:$true] %s16_s10  ;;  %s1930_s12 = int_to_ptr.vmem [resolvable:$true] %s25_s12 }
   0x4   :  { %s1837_s15 = scalar_lea.hbm %s2707_s0, 32 }
   0x5   :  { %p1838_p0 = scmp.ne.s32.totalorder %s2707_s0, %s1837_s15  ;;  %p1841_p1 = scmp.lt.u32.totalorder %s1837_s15, %s2707_s0 }
   0x7   :  { %p1843_p2 = pnand %p1841_p1, %p1838_p0 }
   0x9   :  { %1846 = shalt.err (!%p1843_p2)
}
   0xa   :  { %s1847_s20 = scalar_lea.vmem %s17_s10, 32  ;;  %p1852_p4 = scmp.lt.s32.totalorder %s17_s10, %s17_s10 }
   0xb   :  { %p1848_p3 = scmp.ne.s32.totalorder %s17_s10, %s1847_s20  ;;  %p1853_p5 = scmp.lt.s32.totalorder %s1847_s20, %s1847_s20 }
   0xd   :  { %p1854_p6 = por %p1853_p5, %p1852_p4 }
   0xf   :  { %p1855_p7 = pnand %p1854_p6, %p1848_p3 }
  0x11   :  { %1858 = shalt.err (!%p1855_p7)
}
  0x12   :  { %19 = dma.hbm_to_vmem [thread:$0]  %s2707_s0, 32, %s17_s10, [#allocation3]  }
  0x13   :  { %s1859_s25 = scalar_lea.hbm %s2708_s1, 8192 }
  0x14   :  { %p1860_p8 = scmp.ne.s32.totalorder %s2708_s1, %s1859_s25  ;;  %p1863_p9 = scmp.lt.u32.totalorder %s1859_s25, %s2708_s1 }
  0x16   :  { %p1865_p10 = pnand %p1863_p9, %p1860_p8 }
  0x18   :  { %1868 = shalt.err (!%p1865_p10)
}
  0x19   :  { %s1869_s30 = scalar_lea.vmem %s1930_s12, 8192  ;;  %p1874_p12 = scmp.lt.s32.totalorder %s1930_s12, %s1930_s12 }
  0x1a   :  { %p1870_p11 = scmp.ne.s32.totalorder %s1930_s12, %s1869_s30  ;;  %p1875_p13 = scmp.lt.s32.totalorder %s1869_s30, %s1869_s30 }
  0x1c   :  { %p1876_p0 = por %p1875_p13, %p1874_p12 }
  0x1e   :  { %p1877_p1 = pnand %p1876_p0, %p1870_p11 }
  0x20   :  { %1880 = shalt.err (!%p1877_p1)
}
  0x21   :  { %s1911_s0 = smov 256   ;;  %s1912_s3 = smov 16  }
  0x22   :  { %31 = dma.hbm_to_vmem [thread:$0]  %s2708_s1, 8192, %s1930_s12, [#allocation6], %s1911_s0, %s1911_s0, %s1912_s3  }
  0x23   :  { %1903 = dma.done.wait [#allocation3], 32  }
  0x24   :  { %1904 = vsyncadd [#allocation3], 4294967264 }
  0x25   :  { %1905 = dma.done.wait [#allocation6], 8192  }
  0x26   :  { %1906 = vsyncadd [#allocation6], 4294959104  ;;  %v40_v0 = vld [vmem:[#allocation5 + $0x8] sm:$0xff]  ;;  %v42_v1 = vld [vmem:[#allocation5 + $0x18] sm:$0xff]  ;;  %v2712_v60 = vlaneseq  ;;  %s1914_s1 = smov [#allocation7]  }
  0x27   :  { %v39_v2 = vld [vmem:[#allocation5] sm:$0xff]  ;;  %v114_v3 = vand.u32 4294901760, %v40_v0  ;;  %v118_v4 = vand.u32 4294901760, %v42_v1  ;;  %v41_v5 = vld [vmem:[#allocation5 + $0x10] sm:$0xff]  ;;  %v44_v7 = vld [vmem:[#allocation5 + $0x28] sm:$0xff]  ;;  %s1427_s6 = sshll.u32 %s1914_s1, 4  ;;  %s1428_s6 = int_to_ptr.vmem [resolvable:$true] %s1427_s6 }
  0x28   :  { %v116_v6 = vand.u32 4294901760, %v39_v2  ;;  %v46_v8 = vld [vmem:[#allocation5 + $0x38] sm:$0xff]  ;;  %v120_v9 = vand.u32 4294901760, %v41_v5  ;;  %v122_v10 = vand.u32 4294901760, %v44_v7  ;;  %v43_v12 = vld [vmem:[#allocation5 + $0x20] sm:$0xff]  ;;  %v45_v13 = vld [vmem:[#allocation5 + $0x30] sm:$0xff]  ;;  %p1886_p3 = scmp.lt.s32.totalorder %s1428_s6, %s1428_s6 }
  0x29   :  { %v126_v11 = vand.u32 4294901760, %v46_v8  ;;  %v48_v14 = vld [vmem:[#allocation5 + $0x48] sm:$0xff]  ;;  %v1961_v15 = vpack.c.bf16 %v118_v4, %v114_v3  ;;  %v50_v16 = vld [vmem:[#allocation5 + $0x58] sm:$0xff]  ;;  %v1963_v17 = vld [vmem:[#allocation5 + $0x40] sm:$0xff]  ;;  %v124_v23 = vand.u32 4294901760, %v43_v12  ;;  %v128_v24 = vand.u32 4294901760, %v45_v13 }
  0x2a   :  { %v1965_v18 = vld [vmem:[#allocation5 + $0x50] sm:$0xff]  ;;  %v1967_v19 = vpack.c.bf16 %v120_v9, %v116_v6  ;;  %v1971_v21 = vld [vmem:[#allocation5 + $0x68] sm:$0xff]  ;;  %v1973_v22 = vld [vmem:[#allocation5 + $0x78] sm:$0xff]  ;;  %v130_v25 = vand.u32 4294901760, %v48_v14  ;;  %v134_v26 = vand.u32 4294901760, %v50_v16  ;;  %v132_v27 = vand.u32 4294901760, %v1963_v17 }
  0x2b   :  { %2851 = vst [vmem:[#allocation11_spill] sm:$0xff] %v1961_v15  ;;  %v1969_v20 = vpack.c.bf16 %v126_v11, %v122_v10  ;;  %1438 = vmatprep.subr.bf16.mxu1 %v1961_v15  ;;  %1630 = vmatprep.subr.bf16.mxu0 %v1961_v15  ;;  %v136_v28 = vand.u32 4294901760, %v1965_v18  ;;  %v1983_v29 = vpack.c.bf16 %v128_v24, %v124_v23  ;;  %v138_v30 = vand.u32 4294901760, %v1971_v21  ;;  %v51_v32 = vld [vmem:[#allocation5 + $0x60] sm:$0xff]  ;;  %v53_v33 = vld [vmem:[#allocation5 + $0x70] sm:$0xff]  ;;  %v56_v35 = vld [vmem:[#allocation5 + $0x88] sm:$0xff] }
  0x2c   :  { %2852 = vst [vmem:[#allocation12_spill] sm:$0xff] %v1967_v19  ;;  %1440 = vmatpush1.bf16.msra.mxu1 %v1967_v19  ;;  %1632 = vmatpush1.bf16.msra.mxu0 %v1967_v19  ;;  %v142_v31 = vand.u32 4294901760, %v1973_v22  ;;  %v1987_v34 = vpack.c.bf16 %v134_v26, %v130_v25  ;;  %v58_v36 = vld [vmem:[#allocation5 + $0x98] sm:$0xff]  ;;  %v140_v38 = vand.u32 4294901760, %v51_v32  ;;  %v144_v39 = vand.u32 4294901760, %v53_v33  ;;  %v55_v40 = vld [vmem:[#allocation5 + $0x80] sm:$0xff] }
  0x2d   :  { %2853 = vst [vmem:[#allocation13_spill] sm:$0xff] %v1969_v20  ;;  %1442 = vmatprep.subr.bf16.mxu1 %v1969_v20  ;;  %1634 = vmatprep.subr.bf16.mxu0 %v1969_v20  ;;  %2854 = vst [vmem:[#allocation14_spill] sm:$0xff] %v1983_v29  ;;  %v1991_v37 = vpack.c.bf16 %v136_v28, %v132_v27  ;;  %v57_v41 = vld [vmem:[#allocation5 + $0x90] sm:$0xff]  ;;  %v1993_v42 = vsub.f32 %v40_v0, %v114_v3  ;;  %v146_v44 = vand.u32 4294901760, %v56_v35  ;;  %v60_v50 = vld [vmem:[#allocation5 + $0xa8] sm:$0xff]  ;;  %s1881_s7 = scalar_lea.vmem %s1428_s6, 32 }
  0x2e   :  { %2855 = vst [vmem:[#allocation15_spill] sm:$0xff] %v1987_v34  ;;  %v1997_v43 = vpack.c.bf16 %v142_v31, %v138_v30  ;;  %v150_v45 = vand.u32 4294901760, %v58_v36  ;;  %v1999_v46 = vsub.f32 %v42_v1, %v118_v4  ;;  %v2001_v47 = vsub.f32 %v39_v2, %v116_v6  ;;  %v62_v51 = vld [vmem:[#allocation5 + $0xb8] sm:$0xff]  ;;  %v59_v59 = vld [vmem:[#allocation5 + $0xa0] sm:$0xff]  ;;  %v61_v1 = vld [vmem:[#allocation5 + $0xb0] sm:$0xff]  ;;  %p1882_p2 = scmp.ne.s32.totalorder %s1428_s6, %s1881_s7  ;;  %p1887_p4 = scmp.lt.s32.totalorder %s1881_s7, %s1881_s7 }
  0x2f   :  { %2856 = vst [vmem:[#allocation16_spill] sm:$0xff] %v1991_v37  ;;  %2857 = vst [vmem:[#allocation17_spill] sm:$0xff] %v1993_v42  ;;  %v2003_v48 = vsub.f32 %v41_v5, %v120_v9  ;;  %v2005_v49 = vsub.f32 %v44_v7, %v122_v10  ;;  %v2007_v52 = vsub.f32 %v46_v8, %v126_v11  ;;  %v148_v54 = vand.u32 4294901760, %v55_v40  ;;  %v64_v2 = vld [vmem:[#allocation5 + $0xc8] sm:$0xff]  ;;  %v66_v3 = vld [vmem:[#allocation5 + $0xd8] sm:$0xff] }
  0x30   :  { %1444 = vmatpush1.bf16.msra.mxu1 %v1983_v29  ;;  %1636 = vmatpush1.bf16.msra.mxu0 %v1983_v29  ;;  %2858 = vst [vmem:[#allocation18_spill] sm:$0xff] %v1997_v43  ;;  %2859 = vst [vmem:[#allocation19_spill] sm:$0xff] %v1999_v46  ;;  %v2009_v53 = vsub.f32 %v43_v12, %v124_v23  ;;  %v152_v55 = vand.u32 4294901760, %v57_v41  ;;  %v2011_v56 = vsub.f32 %v45_v13, %v128_v24  ;;  %v63_v12 = vld [vmem:[#allocation5 + $0xc0] sm:$0xff]  ;;  %v65_v13 = vld [vmem:[#allocation5 + $0xd0] sm:$0xff]  ;;  %p1888_p5 = por %p1887_p4, %p1886_p3 }
  0x31   :  { %1446 = vmatprep.subr.bf16.mxu1 %v1987_v34  ;;  %1638 = vmatprep.subr.bf16.mxu0 %v1987_v34  ;;  %2860 = vst [vmem:[#allocation20_spill] sm:$0xff] %v2001_v47  ;;  %2861 = vst [vmem:[#allocation21_spill] sm:$0xff] %v2003_v48  ;;  %v2013_v57 = vsub.f32 %v48_v14, %v130_v25  ;;  %v2017_v58 = vpack.c.bf16 %v144_v39, %v140_v38  ;;  %v154_v63 = vand.u32 4294901760, %v60_v50  ;;  %v80_v34 = vld [vmem:[#allocation5 + $0x148] sm:$0xff]  ;;  %v82_v29 = vld [vmem:[#allocation5 + $0x158] sm:$0xff] }
  0x32   :  { %2862 = vst [vmem:[#allocation22_spill] sm:$0xff] %v2007_v52  ;;  %2863 = vst [vmem:[#allocation23_spill] sm:$0xff] %v2009_v53  ;;  %v2019_v61 = vsub.f32 %v50_v16, %v134_v26  ;;  %v2023_v62 = vpack.c.bf16 %v150_v45, %v146_v44  ;;  %v158_v0 = vand.u32 4294901760, %v62_v51  ;;  %v2026_v4 = vsub.f32 %v1963_v17, %v132_v27  ;;  %v79_v20 = vld [vmem:[#allocation5 + $0x140] sm:$0xff]  ;;  %v81_v19 = vld [vmem:[#allocation5 + $0x150] sm:$0xff]  ;;  %p1889_p6 = pnand %p1888_p5, %p1882_p2 }
  0x33   :  { %2864 = vst [vmem:[#allocation24_spill] sm:$0xff] %v2011_v56  ;;  %2865 = vst [vmem:[#allocation25_spill] sm:$0xff] %v2017_v58  ;;  %v2029_v5 = vsub.f32 %v1965_v18, %v136_v28  ;;  %v2032_v6 = vsub.f32 %v1971_v21, %v138_v30  ;;  %v2035_v7 = vsub.f32 %v1973_v22, %v142_v31  ;;  %v156_v14 = vand.u32 4294901760, %v59_v59  ;;  %v68_v21 = vld [vmem:[#allocation5 + $0xe8] sm:$0xff]  ;;  %v70_v22 = vld [vmem:[#allocation5 + $0xf8] sm:$0xff] }
  0x34   :  { %1448 = vmatpush1.bf16.msra.mxu1 %v1991_v37  ;;  %1640 = vmatpush1.bf16.msra.mxu0 %v1991_v37  ;;  %2866 = vst [vmem:[#allocation26_spill] sm:$0xff] %v2023_v62  ;;  %v2037_v8 = vsub.f32 %v51_v32, %v140_v38  ;;  %v2039_v9 = vsub.f32 %v53_v33, %v144_v39  ;;  %v160_v16 = vand.u32 4294901760, %v61_v1  ;;  %v162_v17 = vand.u32 4294901760, %v64_v2  ;;  %v67_v31 = vld [vmem:[#allocation5 + $0xe0] sm:$0xff]  ;;  %v69_v32 = vld [vmem:[#allocation5 + $0xf0] sm:$0xff]  ;;  %v72_v39 = vld [vmem:[#allocation5 + $0x108] sm:$0xff] }
  0x35   :  { %1450 = vmatprep.subr.bf16.mxu1 %v1997_v43  ;;  %1642 = vmatprep.subr.bf16.mxu0 %v1997_v43  ;;  %2867 = vst [vmem:[#allocation27_spill] sm:$0xff] %v2032_v6  ;;  %2868 = vst [vmem:[#allocation28_spill] sm:$0xff] %v2035_v7  ;;  %v2041_v10 = vsub.f32 %v56_v35, %v146_v44  ;;  %v2043_v11 = vpack.c.bf16 %v152_v55, %v148_v54  ;;  %v166_v18 = vand.u32 4294901760, %v66_v3  ;;  %v74_v44 = vld [vmem:[#allocation5 + $0x118] sm:$0xff] }
  0x36   :  { %2869 = vst [vmem:[#allocation29_spill] sm:$0xff] %v2037_v8  ;;  %2870 = vst [vmem:[#allocation30_spill] sm:$0xff] %v2039_v9  ;;  %v2048_v23 = vsub.f32 %v58_v36, %v150_v45  ;;  %v2051_v24 = vsub.f32 %v55_v40, %v148_v54  ;;  %v2053_v25 = vpack.c.bf16 %v158_v0, %v154_v63  ;;  %v164_v28 = vand.u32 4294901760, %v63_v12 }
  0x37   :  { %2871 = vst [vmem:[#allocation31_spill] sm:$0xff] %v2041_v10  ;;  %2872 = vst [vmem:[#allocation32_spill] sm:$0xff] %v2043_v11  ;;  %v2055_v26 = vsub.f32 %v57_v41, %v152_v55  ;;  %v2057_v27 = vsub.f32 %v60_v50, %v154_v63  ;;  %v168_v30 = vand.u32 4294901760, %v65_v13  ;;  %v2059_v33 = vsub.f32 %v62_v51, %v158_v0  ;;  %v71_v50 = vld [vmem:[#allocation5 + $0x100] sm:$0xff]  ;;  %v73_v0 = vld [vmem:[#allocation5 + $0x110] sm:$0xff] }
  0x38   :  { %1452 = vmatpush1.bf16.msra.mxu1 %v2017_v58  ;;  %1644 = vmatpush1.bf16.msra.mxu0 %v2017_v58  ;;  %2873 = vst [vmem:[#allocation33_spill] sm:$0xff] %v2048_v23  ;;  %2874 = vst [vmem:[#allocation34_spill] sm:$0xff] %v2051_v24  ;;  %v2061_v35 = vsub.f32 %v59_v59, %v156_v14  ;;  %v170_v36 = vand.u32 4294901760, %v68_v21  ;;  %v174_v38 = vand.u32 4294901760, %v70_v22  ;;  %v2072_v51 = vshrl.u32 %v2712_v60, 7 }
  0x39   :  { %1454 = vmatprep.subr.bf16.mxu1 %v2023_v62  ;;  %1646 = vmatprep.subr.bf16.mxu0 %v2023_v62  ;;  %2875 = vst [vmem:[#allocation35_spill] sm:$0xff] %v2053_v25  ;;  %2876 = vst [vmem:[#allocation36_spill] sm:$0xff] %v2055_v26  ;;  %v2065_v40 = vpack.c.bf16 %v160_v16, %v156_v14  ;;  %v2067_v41 = vsub.f32 %v61_v1, %v160_v16  ;;  %v172_v59 = vand.u32 4294901760, %v67_v31  ;;  %v76_v14 = vld [vmem:[#allocation5 + $0x128] sm:$0xff]  ;;  %v78_v1 = vld [vmem:[#allocation5 + $0x138] sm:$0xff] }
  0x3a   :  { %2877 = vst [vmem:[#allocation37_spill] sm:$0xff] %v2057_v27  ;;  %v2069_v45 = vpack.c.bf16 %v166_v18, %v162_v17  ;;  %2881 = vst [vmem:[#allocation41_spill] sm:$0xff] %v2072_v51  ;;  %v2076_v54 = vsub.f32 %v64_v2, %v162_v17  ;;  %v2078_v55 = vsub.f32 %v66_v3, %v166_v18  ;;  %v176_v63 = vand.u32 4294901760, %v69_v32  ;;  %v75_v3 = vld [vmem:[#allocation5 + $0x120] sm:$0xff]  ;;  %v77_v17 = vld [vmem:[#allocation5 + $0x130] sm:$0xff] }
  0x3b   :  { %2878 = vst [vmem:[#allocation38_spill] sm:$0xff] %v2065_v40  ;;  %2879 = vst [vmem:[#allocation39_spill] sm:$0xff] %v2067_v41  ;;  %v2080_v16 = vpack.c.bf16 %v168_v30, %v164_v28  ;;  %v178_v62 = vand.u32 4294901760, %v72_v39  ;;  %v182_v60 = vand.u32 4294901760, %v74_v44  ;;  %v2084_v58 = vsub.f32 %v65_v13, %v168_v30 }
  0x3c   :  { %1456 = vmatpush1.bf16.msra.mxu1 %v2043_v11  ;;  %1648 = vmatpush1.bf16.msra.mxu0 %v2043_v11  ;;  %2880 = vst [vmem:[#allocation40_spill] sm:$0xff] %v2069_v45  ;;  %2882 = vst [vmem:[#allocation42_spill] sm:$0xff] %v2076_v54  ;;  %v2082_v11 = vsub.f32 %v63_v12, %v164_v28  ;;  %v2086_v43 = vpack.c.bf16 %v174_v38, %v170_v36  ;;  %v180_v2 = vand.u32 4294901760, %v71_v50 }
  0x3d   :  { %1458 = vmatprep.subr.bf16.mxu1 %v2053_v25  ;;  %1650 = vmatprep.subr.bf16.mxu0 %v2053_v25  ;;  %2883 = vst [vmem:[#allocation43_spill] sm:$0xff] %v2078_v55  ;;  %2884 = vst [vmem:[#allocation44_spill] sm:$0xff] %v2080_v16  ;;  %v2088_v25 = vsub.f32 %v68_v21, %v170_v36  ;;  %v2092_v18 = vsub.f32 %v70_v22, %v174_v38  ;;  %v184_v37 = vand.u32 4294901760, %v73_v0 }
  0x3e   :  { %2885 = vst [vmem:[#allocation45_spill] sm:$0xff] %v2082_v11  ;;  %2886 = vst [vmem:[#allocation46_spill] sm:$0xff] %v2084_v58  ;;  %v186_v12 = vand.u32 4294901760, %v76_v14  ;;  %v190_v28 = vand.u32 4294901760, %v78_v1  ;;  %v2096_v13 = vpack.c.bf16 %v176_v63, %v172_v59  ;;  %v2098_v21 = vsub.f32 %v67_v31, %v172_v59  ;;  %v84_v58 = vld [vmem:[#allocation5 + $0x168] sm:$0xff]  ;;  %v86_v11 = vld [vmem:[#allocation5 + $0x178] sm:$0xff] }
  0x3f   :  { %2887 = vst [vmem:[#allocation47_spill] sm:$0xff] %v2086_v43  ;;  %2888 = vst [vmem:[#allocation48_spill] sm:$0xff] %v2088_v25  ;;  %v2100_v30 = vsub.f32 %v69_v32, %v176_v63  ;;  %v2102_v36 = vpack.c.bf16 %v182_v60, %v178_v62  ;;  %v188_v22 = vand.u32 4294901760, %v75_v3  ;;  %v192_v38 = vand.u32 4294901760, %v77_v17 }
  0x40   :  { %1460 = vmatpush1.bf16.msra.mxu1 %v2065_v40  ;;  %1652 = vmatpush1.bf16.msra.mxu0 %v2065_v40  ;;  %2889 = vst [vmem:[#allocation49_spill] sm:$0xff] %v2092_v18  ;;  %2890 = vst [vmem:[#allocation50_spill] sm:$0xff] %v2096_v13  ;;  %v2104_v40 = vsub.f32 %v72_v39, %v178_v62  ;;  %v2106_v15 = vsub.f32 %v74_v44, %v182_v60  ;;  %v194_v25 = vand.u32 4294901760, %v80_v34  ;;  %v83_v39 = vld [vmem:[#allocation5 + $0x160] sm:$0xff] }
  0x41   :  { %1462 = vmatprep.subr.bf16.mxu1 %v2069_v45  ;;  %1654 = vmatprep.subr.bf16.mxu0 %v2069_v45  ;;  %2891 = vst [vmem:[#allocation51_spill] sm:$0xff] %v2098_v21  ;;  %2892 = vst [vmem:[#allocation52_spill] sm:$0xff] %v2100_v30  ;;  %v2108_v18 = vsub.f32 %v71_v50, %v180_v2  ;;  %v198_v45 = vand.u32 4294901760, %v82_v29  ;;  %v2112_v31 = vpack.c.bf16 %v184_v37, %v180_v2  ;;  %v88_v2 = vld [vmem:[#allocation5 + $0x188] sm:$0xff] }
  0x42   :  { %2893 = vst [vmem:[#allocation53_spill] sm:$0xff] %v2102_v36  ;;  %2894 = vst [vmem:[#allocation54_spill] sm:$0xff] %v2104_v40  ;;  %v2114_v62 = vsub.f32 %v73_v0, %v184_v37  ;;  %v2116_v32 = vpack.c.bf16 %v190_v28, %v186_v12  ;;  %v2121_v44 = vsub.f32 %v76_v14, %v186_v12  ;;  %v196_v59 = vand.u32 4294901760, %v79_v20  ;;  %v89_v12 = vld [vmem:[#allocation5 + $0x190] sm:$0xff] }
  0x43   :  { %2895 = vst [vmem:[#allocation55_spill] sm:$0xff] %v2106_v15  ;;  %2896 = vst [vmem:[#allocation56_spill] sm:$0xff] %v2108_v18  ;;  %v2123_v50 = vsub.f32 %v78_v1, %v190_v28  ;;  %v200_v63 = vand.u32 4294901760, %v81_v19  ;;  %v90_v18 = vld [vmem:[#allocation5 + $0x198] sm:$0xff]  ;;  %v2125_v37 = vpack.c.bf16 %v192_v38, %v188_v22  ;;  %v2127_v0 = vsub.f32 %v75_v3, %v188_v22  ;;  %v87_v1 = vld [vmem:[#allocation5 + $0x180] sm:$0xff] }
  0x44   :  { %1464 = vmatpush1.bf16.msra.mxu1 %v2080_v16  ;;  %1656 = vmatpush1.bf16.msra.mxu0 %v2080_v16  ;;  %2897 = vst [vmem:[#allocation57_spill] sm:$0xff] %v2112_v31  ;;  %2898 = vst [vmem:[#allocation58_spill] sm:$0xff] %v2114_v62  ;;  %v85_v16 = vld [vmem:[#allocation5 + $0x170] sm:$0xff]  ;;  %v202_v62 = vand.u32 4294901760, %v84_v58  ;;  %v206_v15 = vand.u32 4294901760, %v86_v11  ;;  %v2129_v60 = vsub.f32 %v77_v17, %v192_v38  ;;  %v204_v28 = vand.u32 4294901760, %v83_v39 }
  0x45   :  { %2899 = vst [vmem:[#allocation59_spill] sm:$0xff] %v2116_v32  ;;  %1466 = vmatprep.subr.bf16.mxu1 %v2086_v43  ;;  %1658 = vmatprep.subr.bf16.mxu0 %v2086_v43  ;;  %2900 = vst [vmem:[#allocation60_spill] sm:$0xff] %v2121_v44  ;;  %v2131_v40 = vpack.c.bf16 %v198_v45, %v194_v25  ;;  %v2133_v43 = vsub.f32 %v80_v34, %v194_v25  ;;  %v210_v3 = vand.u32 4294901760, %v88_v2  ;;  %v94_v44 = vld [vmem:[#allocation5 + $0x1b8] sm:$0xff] }
  0x46   :  { %2901 = vst [vmem:[#allocation61_spill] sm:$0xff] %v2123_v50  ;;  %2902 = vst [vmem:[#allocation62_spill] sm:$0xff] %v2125_v37  ;;  %v2135_v14 = vsub.f32 %v82_v29, %v198_v45  ;;  %v208_v50 = vand.u32 4294901760, %v85_v16  ;;  %v214_v22 = vand.u32 4294901760, %v90_v18  ;;  %v2141_v34 = vpack.c.bf16 %v200_v63, %v196_v59 }
  0x47   :  { %2903 = vst [vmem:[#allocation63_spill] sm:$0xff] %v2127_v0  ;;  %2904 = vst [vmem:[#allocation64_spill] sm:$0xff] %v2129_v60  ;;  %v92_v0 = vld [vmem:[#allocation5 + $0x1a8] sm:$0xff]  ;;  %v2143_v29 = vsub.f32 %v79_v20, %v196_v59  ;;  %v2145_v25 = vsub.f32 %v81_v19, %v200_v63  ;;  %v110_v45 = vsub.s32 1, %v2072_v51  ;;  %v2148_v17 = vpack.c.bf16 %v206_v15, %v202_v62  ;;  %v93_v60 = vld [vmem:[#allocation5 + $0x1b0] sm:$0xff] }
  0x48   :  { %2905 = vst [vmem:[#allocation65_spill] sm:$0xff] %v2131_v40  ;;  %2906 = vst [vmem:[#allocation66_spill] sm:$0xff] %v2133_v43  ;;  %1468 = vmatpush1.bf16.msra.mxu1 %v2096_v13  ;;  %1660 = vmatpush1.bf16.msra.mxu0 %v2096_v13  ;;  %v2150_v38 = vsub.f32 %v84_v58, %v202_v62  ;;  %v212_v13 = vand.u32 4294901760, %v87_v1  ;;  %v91_v43 = vld [vmem:[#allocation5 + $0x1a0] sm:$0xff]  ;;  %v2152_v30 = vsub.f32 %v86_v11, %v206_v15  ;;  %v38_v20 = vld [vmem:[#allocation2] sm:$0x3] }
  0x49   :  { %2907 = vst [vmem:[#allocation67_spill] sm:$0xff] %v2135_v14  ;;  %1470 = vmatprep.subr.bf16.mxu1 %v2102_v36  ;;  %1662 = vmatprep.subr.bf16.mxu0 %v2102_v36  ;;  %2908 = vst [vmem:[#allocation68_spill] sm:$0xff] %v2141_v34  ;;  %v216_v14 = vand.u32 4294901760, %v89_v12  ;;  %v2154_v21 = vsub.f32 %v83_v39, %v204_v28  ;;  %v218_v36 = vand.u32 4294901760, %v92_v0  ;;  %v222_v55 = vand.u32 4294901760, %v94_v44  ;;  %v96_v62 = vld [vmem:[#allocation5 + $0x1c8] sm:$0xff] }
  0x4a   :  { %2909 = vst [vmem:[#allocation69_spill] sm:$0xff] %v2143_v29  ;;  %2910 = vst [vmem:[#allocation70_spill] sm:$0xff] %v2145_v25  ;;  %v2158_v19 = vpack.c.bf16 %v208_v50, %v204_v28  ;;  %v2160_v59 = vsub.f32 %v85_v16, %v208_v50  ;;  %v2162_v58 = vpack.c.bf16 %v214_v22, %v210_v3  ;;  %v220_v39 = vand.u32 4294901760, %v91_v43 }
  0x4b   :  { %2911 = vst [vmem:[#allocation71_spill] sm:$0xff] %v2148_v17  ;;  %2912 = vst [vmem:[#allocation72_spill] sm:$0xff] %v2150_v38  ;;  %v2166_v15 = vsub.f32 %v88_v2, %v210_v3  ;;  %v2168_v11 = vsub.f32 %v90_v18, %v214_v22  ;;  %v224_v63 = vand.u32 4294901760, %v93_v60  ;;  %v2170_v28 = vpack.c.bf16 %v216_v14, %v212_v13  ;;  %v100_v3 = vld [vmem:[#allocation5 + $0x1e8] sm:$0xff] }
  0x4c   :  { %2913 = vst [vmem:[#allocation73_spill] sm:$0xff] %v2152_v30  ;;  %2914 = vst [vmem:[#allocation74_spill] sm:$0xff] %v2154_v21  ;;  %1472 = vmatpush1.bf16.msra.mxu1 %v2112_v31  ;;  %1664 = vmatpush1.bf16.msra.mxu0 %v2112_v31  ;;  %v98_v21 = vld [vmem:[#allocation5 + $0x1d8] sm:$0xff]  ;;  %v95_v30 = vld [vmem:[#allocation5 + $0x1c0] sm:$0xff]  ;;  %v2172_v16 = vsub.f32 %v87_v1, %v212_v13  ;;  %v2174_v50 = vsub.f32 %v89_v12, %v216_v14  ;;  %v226_v18 = vand.u32 4294901760, %v96_v62 }
  0x4d   :  { %2915 = vst [vmem:[#allocation75_spill] sm:$0xff] %v2158_v19  ;;  %2916 = vst [vmem:[#allocation76_spill] sm:$0xff] %v2160_v59  ;;  %1474 = vmatprep.subr.bf16.mxu1 %v2116_v32  ;;  %1666 = vmatprep.subr.bf16.mxu0 %v2116_v32  ;;  %v97_v31 = vld [vmem:[#allocation5 + $0x1d0] sm:$0xff]  ;;  %v2923_v59 = vsub.s32 0, %v2072_v51  ;;  %v2178_v25 = vpack.c.bf16 %v222_v55, %v218_v36  ;;  %v2180_v2 = vsub.f32 %v92_v0, %v218_v36 }
  0x4e   :  { %2917 = vst [vmem:[#allocation77_spill] sm:$0xff] %v2162_v58  ;;  %2918 = vst [vmem:[#allocation78_spill] sm:$0xff] %v2166_v15  ;;  %v111_v22 = vrot.slane %v38_v20, %v110_v45  ;;  %v230_v32 = vand.u32 4294901760, %v98_v21  ;;  %v232_v13 = vand.u32 4294901760, %v97_v31  ;;  %v2188_v14 = vsub.f32 %v94_v44, %v222_v55 }
  0x4f   :  { %2919 = vst [vmem:[#allocation79_spill] sm:$0xff] %v2168_v11  ;;  %2920 = vst [vmem:[#allocation80_spill] sm:$0xff] %v2170_v28  ;;  %v107_v38 = vrot.slane %v38_v20, %v2923_v59  ;;  %v228_v11 = vand.u32 4294901760, %v95_v30  ;;  %v2190_v36 = vpack.c.bf16 %v224_v63, %v220_v39  ;;  %v2192_v0 = vsub.f32 %v91_v43, %v220_v39  ;;  %v102_v59 = vld [vmem:[#allocation5 + $0x1f8] sm:$0xff] }
  0x50   :  { %2921 = vst [vmem:[#allocation81_spill] sm:$0xff] %v2172_v16  ;;  %2922 = vst [vmem:[#allocation82_spill] sm:$0xff] %v2174_v50  ;;  %1476 = vmatpush1.bf16.msra.mxu1 %v2125_v37  ;;  %1668 = vmatpush1.bf16.msra.mxu0 %v2125_v37  ;;  %v2194_v12 = vand.u32 4294901760, %v111_v22  ;;  %v2196_v45 = vsub.f32 %v93_v60, %v224_v63  ;;  %v2198_v20 = vsub.f32 %v96_v62, %v226_v18 }
  0x51   :  { %2924 = vst [vmem:[#allocation83_spill] sm:$0xff] %v2178_v25  ;;  %2925 = vst [vmem:[#allocation84_spill] sm:$0xff] %v2180_v2  ;;  %v2184_v1 = vand.u32 4294901760, %v107_v38  ;;  %1478 = vmatprep.subr.bf16.mxu1 %v2131_v40  ;;  %1670 = vmatprep.subr.bf16.mxu0 %v2131_v40  ;;  %v234_v51 = vand.u32 4294901760, %v100_v3  ;;  %v261_v37 = vand.u32 4294901760, %v1993_v42  ;;  %v273_v55 = vand.u32 4294901760, %v1999_v46 }
  0x52   :  { %2927 = vst [vmem:[#allocation86_spill] sm:$0xff] %v2188_v14  ;;  %2928 = vst [vmem:[#allocation87_spill] sm:$0xff] %v2190_v36  ;;  %v2202_v2 = vsub.f32 %v111_v22, %v2194_v12  ;;  %v267_v43 = vand.u32 4294901760, %v2001_v47  ;;  %v2211_v60 = vpack.c.bf16 %v230_v32, %v226_v18  ;;  %v2213_v62 = vsub.f32 %v98_v21, %v230_v32  ;;  %v99_v22 = vld [vmem:[#allocation5 + $0x1e0] sm:$0xff] }
  0x53   :  { %2926 = vst [vmem:[#allocation85_spill] sm:$0xff] %v2184_v1  ;;  %2929 = vst [vmem:[#allocation88_spill] sm:$0xff] %v2192_v0  ;;  %v2206_v44 = vsub.f32 %v107_v38, %v2184_v1  ;;  %v2215_v39 = vpack.c.bf16 %v232_v13, %v228_v11  ;;  %v279_v63 = vand.u32 4294901760, %v2003_v48  ;;  %v238_v38 = vand.u32 4294901760, %v102_v59 }
  0x54   :  { %2930 = vst [vmem:[#allocation89_spill] sm:$0xff] %v2194_v12  ;;  %2931 = vst [vmem:[#allocation90_spill] sm:$0xff] %v2196_v45  ;;  %1480 = vmatpush1.bf16.msra.mxu1 %v2141_v34  ;;  %1672 = vmatpush1.bf16.msra.mxu0 %v2141_v34  ;;  %v244_v40 = vand.u32 4294901760, %v2202_v2  ;;  %v285_v1 = vand.u32 4294901760, %v2005_v49  ;;  %v297_v34 = vand.u32 4294901760, %v2007_v52  ;;  %v2223_v18 = vsub.f32 %v95_v30, %v228_v11 }
  0x55   :  { %2932 = vst [vmem:[#allocation91_spill] sm:$0xff] %v2198_v20  ;;  %2933 = vst [vmem:[#allocation92_spill] sm:$0xff] %v2202_v2  ;;  %1482 = vmatprep.subr.bf16.mxu1 %v2148_v17  ;;  %1674 = vmatprep.subr.bf16.mxu0 %v2148_v17  ;;  %v2225_v21 = vsub.f32 %v97_v31, %v232_v13  ;;  %v2227_v32 = vsub.f32 %v100_v3, %v234_v51  ;;  %v236_v30 = vand.u32 4294901760, %v99_v22 }
  0x56   :  { %2934 = vst [vmem:[#allocation93_spill] sm:$0xff] %v2206_v44  ;;  %2935 = vst [vmem:[#allocation94_spill] sm:$0xff] %v2211_v60  ;;  %v262_v20 = vsub.f32 %v1993_v42, %v261_v37  ;;  %v245_v45 = vsub.f32 %v2202_v2, %v244_v40  ;;  %v274_v17 = vsub.f32 %v1999_v46, %v273_v55  ;;  %986 = vmatprep.mubr.f32.mxu0 %v244_v40 }
  0x57   :  { %2936 = vst [vmem:[#allocation95_spill] sm:$0xff] %v2213_v62  ;;  %2937 = vst [vmem:[#allocation96_spill] sm:$0xff] %v2215_v39  ;;  %v101_v62 = vld [vmem:[#allocation5 + $0x1f0] sm:$0xff]  ;;  %v268_v14 = vsub.f32 %v2001_v47, %v267_v43  ;;  %v280_v31 = vsub.f32 %v2003_v48, %v279_v63  ;;  %v291_v11 = vand.u32 4294901760, %v2009_v53  ;;  %v303_v3 = vand.u32 4294901760, %v2011_v56 }
  0x58   :  { %2938 = vst [vmem:[#allocation97_spill] sm:$0xff] %v2225_v21  ;;  %2939 = vst [vmem:[#allocation98_spill] sm:$0xff] %v2227_v32  ;;  %1484 = vmatpush1.bf16.msra.mxu1 %v2158_v19  ;;  %1676 = vmatpush1.bf16.msra.mxu0 %v2158_v19  ;;  %v240_v40 = vand.u32 4294901760, %v101_v62  ;;  %v246_v13 = vand.u32 4294901760, %v245_v45  ;;  %v286_v0 = vsub.f32 %v2005_v49, %v285_v1  ;;  %v263_v48 = vand.u32 4294901760, %v262_v20 }
  0x59   :  { %1486 = vmatprep.subr.bf16.mxu1 %v2162_v58  ;;  %1678 = vmatprep.subr.bf16.mxu0 %v2162_v58  ;;  %v298_v2 = vsub.f32 %v2007_v52, %v297_v34  ;;  %v2243_v47 = vpack.c.bf16 %v238_v38, %v234_v51  ;;  %v2245_v19 = vsub.f32 %v102_v59, %v238_v38  ;;  %v275_v42 = vand.u32 4294901760, %v274_v17 }
  0x5a   :  { %v2247_v46 = vsub.f32 %v99_v22, %v236_v30  ;;  %247 = vmatprep.mubr.f32.mxu1 %v246_v13  ;;  %v2942_v32 = vand.u32 4294901760, %v2206_v44  ;;  %v269_v58 = vand.u32 4294901760, %v268_v14  ;;  %v309_v45 = vand.u32 4294901760, %v2013_v57 }
  0x5b   :  { %2940 = vst [vmem:[#allocation99_spill] sm:$0xff] %v2243_v47  ;;  %v281_v51 = vand.u32 4294901760, %v280_v31  ;;  %v292_v59 = vsub.f32 %v2009_v53, %v291_v11  ;;  %v304_v38 = vsub.f32 %v2011_v56, %v303_v3  ;;  %v321_v20 = vand.u32 4294901760, %v2019_v61 }
  0x5c   :  { %2941 = vst [vmem:[#allocation100_spill] sm:$0xff] %v2247_v46  ;;  %v2252_v21 = vsub.f32 %v2206_v44, %v2942_v32  ;;  %1488 = vmatpush1.bf16.msra.mxu1 %v2170_v28  ;;  %1680 = vmatpush1.bf16.msra.mxu0 %v2170_v28  ;;  %v2262_v17 = vpack.c.bf16 %v240_v40, %v236_v30  ;;  %v287_v14 = vand.u32 4294901760, %v286_v0  ;;  %v299_v22 = vand.u32 4294901760, %v298_v2 }
  0x5d   :  { %1490 = vmatprep.subr.bf16.mxu1 %v2178_v25  ;;  %1682 = vmatprep.subr.bf16.mxu0 %v2178_v25  ;;  %v315_v32 = vand.u32 4294901760, %v2026_v4  ;;  %v2265_v13 = vsub.f32 %v101_v62, %v240_v40  ;;  %v1693_v28 = vpack.c.bf16 %v273_v55, %v261_v37  ;;  %v2267_v31 = vpack.c.bf16 %v279_v63, %v267_v43 }
  0x5e   :  { %2943 = vst [vmem:[#allocation101_spill] sm:$0xff] %v2262_v17  ;;  %v327_v46 = vand.u32 4294901760, %v2029_v5  ;;  %v1501_v56 = vpack.c.bf16 %v275_v42, %v263_v48  ;;  %v252_v53 = vand.u32 4294901760, %v2252_v21  ;;  %v2271_v52 = vpack.c.bf16 %v297_v34, %v285_v1 }
  0x5f   :  { %2944 = vst [vmem:[#allocation102_spill] sm:$0xff] %v2265_v13  ;;  %v310_v25 = vsub.f32 %v2013_v57, %v309_v45  ;;  %v1503_v2 = vpack.c.bf16 %v281_v51, %v269_v58  ;;  %v293_v0 = vand.u32 4294901760, %v292_v59  ;;  %v305_v62 = vand.u32 4294901760, %v304_v38 }
  0x60   :  { %1492 = vmatpush1.bf16.msra.mxu1 %v2190_v36  ;;  %1684 = vmatpush1.bf16.msra.mxu0 %v2190_v36  ;;  %v322_v37 = vsub.f32 %v2019_v61, %v321_v20  ;;  %v1505_v42 = vpack.c.bf16 %v299_v22, %v287_v14  ;;  %v2279_v48 = vpack.c.bf16 %v303_v3, %v291_v11  ;;  %v333_v1 = vand.u32 4294901760, %v2032_v6 }
  0x61   :  { %1494 = vmatprep.subr.bf16.mxu1 %v2211_v60  ;;  %1686 = vmatprep.subr.bf16.mxu0 %v2211_v60  ;;  %v316_v34 = vsub.f32 %v2026_v4, %v315_v32  ;;  %v328_v55 = vsub.f32 %v2029_v5, %v327_v46  ;;  %v345_v43 = vand.u32 4294901760, %v2035_v7  ;;  %v339_v58 = vand.u32 4294901760, %v2037_v8 }
  0x62   :  { %v351_v63 = vand.u32 4294901760, %v2039_v9  ;;  %v311_v21 = vand.u32 4294901760, %v310_v25  ;;  %v357_v30 = vand.u32 4294901760, %v2041_v10  ;;  %v369_v40 = vand.u32 4294901760, %v2048_v23 }
  0x63   :  { %v363_v11 = vand.u32 4294901760, %v2051_v24  ;;  %v1507_v3 = vpack.c.bf16 %v305_v62, %v293_v0  ;;  %v323_v51 = vand.u32 4294901760, %v322_v37  ;;  %v2292_v59 = vpack.c.bf16 %v321_v20, %v309_v45 }
  0x64   :  { %1496 = vmatpush1.bf16.msra.mxu1 %v2215_v39  ;;  %1688 = vmatpush1.bf16.msra.mxu0 %v2215_v39  ;;  %v375_v38 = vand.u32 4294901760, %v2055_v26  ;;  %v317_v25 = vand.u32 4294901760, %v316_v34  ;;  %v334_v14 = vsub.f32 %v2032_v6, %v333_v1  ;;  %v381_v22 = vand.u32 4294901760, %v2057_v27 }
  0x65   :  { %1498 = vmatprep.subr.bf16.mxu1 %v2243_v47  ;;  %1690 = vmatprep.subr.bf16.mxu0 %v2243_v47  ;;  %v393_v60 = vand.u32 4294901760, %v2059_v33  ;;  %v329_v36 = vand.u32 4294901760, %v328_v55  ;;  %v346_v39 = vsub.f32 %v2035_v7, %v345_v43  ;;  %v340_v0 = vsub.f32 %v2037_v8, %v339_v58 }
  0x66   :  { %v352_v45 = vsub.f32 %v2039_v9, %v351_v63  ;;  %v2303_v20 = vpack.c.bf16 %v327_v46, %v315_v32  ;;  %v358_v62 = vsub.f32 %v2041_v10, %v357_v30  ;;  %v370_v37 = vsub.f32 %v2048_v23, %v369_v40 }
  0x67   :  { %v364_v34 = vsub.f32 %v2051_v24, %v363_v11  ;;  %v2310_v47 = vpack.c.bf16 %v345_v43, %v333_v1  ;;  %v376_v55 = vsub.f32 %v2055_v26, %v375_v38  ;;  %v387_v13 = vand.u32 4294901760, %v2061_v35 }
  0x68   :  { %1500 = vmatpush1.bf16.msra.mxu1 %v2262_v17  ;;  %1692 = vmatpush1.bf16.msra.mxu0 %v2262_v17  ;;  %v399_v9 = vand.u32 4294901760, %v2067_v41  ;;  %v1509_v46 = vpack.c.bf16 %v323_v51, %v311_v21  ;;  %v335_v32 = vand.u32 4294901760, %v334_v14  ;;  %v382_v23 = vsub.f32 %v2057_v27, %v381_v22 }
  0x69   :  { %1502 = vmatprep.subr.bf16.mxu1 %v1501_v56  ;;  %1694 = vmatprep.subr.bf16.mxu0 %v1693_v28  ;;  %v394_v24 = vsub.f32 %v2059_v33, %v393_v60  ;;  %v1511_v10 = vpack.c.bf16 %v329_v36, %v317_v25  ;;  %v347_v8 = vand.u32 4294901760, %v346_v39  ;;  %v341_v7 = vand.u32 4294901760, %v340_v0  ;;  %v2946_v39 = vld [vmem:[#allocation43_spill] sm:$0xff]  ;;  %v2947_v0 = vld [vmem:[#allocation45_spill] sm:$0xff] }
  0x6a   :  { %v353_v17 = vand.u32 4294901760, %v352_v45  ;;  %v2945_v1 = vand.u32 4294901760, %v2206_v44  ;;  %v359_v43 = vand.u32 4294901760, %v358_v62  ;;  %v371_v26 = vand.u32 4294901760, %v370_v37 }
  0x6b   :  { %253 = vmatmul.mubr.f32.vlgmr.msra.gmra.mrb[0].mxu1 %v252_v53  ;;  %v365_v6 = vand.u32 4294901760, %v364_v34  ;;  %v405_v56 = vand.u32 4294901760, %v2076_v54  ;;  %v377_v28 = vand.u32 4294901760, %v376_v55  ;;  %v388_v21 = vsub.f32 %v2061_v35, %v387_v13  ;;  %v2948_v34 = vld [vmem:[#allocation46_spill] sm:$0xff] }
  0x6c   :  { %990 = vmatmul.mubr.f32.vlgmr.msra.gmra.mrb[0].mxu0 %v2945_v1  ;;  %1504 = vmatpush1.bf16.msra.mxu1 %v1503_v2  ;;  %v400_v36 = vsub.f32 %v2067_v41, %v399_v9  ;;  %v417_v51 = vand.u32 4294901760, %v2946_v39  ;;  %v1707_v53 = vpack.c.bf16 %v351_v63, %v339_v58  ;;  %v383_v25 = vand.u32 4294901760, %v382_v23 }
  0x6d   :  { %1696 = vmatpush1.bf16.msra.mxu0 %v2267_v31  ;;  %1506 = vmatprep.subr.bf16.mxu1 %v1505_v42  ;;  %v395_v14 = vand.u32 4294901760, %v394_v24  ;;  %v411_v45 = vand.u32 4294901760, %v2947_v0  ;;  %v1513_v62 = vpack.c.bf16 %v347_v8, %v335_v32  ;;  %v1515_v37 = vpack.c.bf16 %v353_v17, %v341_v7 }
  0x6e   :  { %1698 = vmatprep.subr.bf16.mxu0 %v2271_v52  ;;  %v1709_v2 = vpack.c.bf16 %v369_v40, %v357_v30  ;;  %v423_v31 = vand.u32 4294901760, %v2948_v34  ;;  %644 = vmatprep.mubr.f32.mxu1 %v2194_v12  ;;  %v1517_v55 = vpack.c.bf16 %v371_v26, %v359_v43  ;;  %v2329_v1 = vpack.c.bf16 %v375_v38, %v363_v11  ;;  %v2950_v40 = vld [vmem:[#allocation49_spill] sm:$0xff]  ;;  %v2954_v43 = vld [vmem:[#allocation55_spill] sm:$0xff] }
  0x6f   :  { %1253 = vmatprep.mubr.f32.mxu0 %v2194_v12  ;;  %v2331_v42 = vpack.c.bf16 %v393_v60, %v381_v22  ;;  %v406_v52 = vsub.f32 %v2076_v54, %v405_v56  ;;  %v1519_v23 = vpack.c.bf16 %v377_v28, %v365_v6  ;;  %v389_v8 = vand.u32 4294901760, %v388_v21  ;;  %v2949_v60 = vld [vmem:[#allocation48_spill] sm:$0xff]  ;;  %v2958_v12 = vld [vmem:[#allocation61_spill] sm:$0xff]  ;;  %v2961_v54 = vld [vmem:[#allocation66_spill] sm:$0xff] }
  0x70   :  { %1508 = vmatpush1.bf16.msra.mxu1 %v1507_v3  ;;  %v401_v7 = vand.u32 4294901760, %v400_v36  ;;  %v418_v24 = vsub.f32 %v2946_v39, %v417_v51  ;;  %v1521_v17 = vpack.c.bf16 %v395_v14, %v383_v25  ;;  %v2337_v58 = vpack.c.bf16 %v399_v9, %v387_v13  ;;  %v2952_v3 = vld [vmem:[#allocation52_spill] sm:$0xff]  ;;  %v2956_v25 = vld [vmem:[#allocation58_spill] sm:$0xff] }
  0x71   :  { %1700 = vmatpush1.bf16.msra.mxu0 %v2279_v48  ;;  %1510 = vmatprep.subr.bf16.mxu1 %v1509_v46  ;;  %v412_v26 = vsub.f32 %v2947_v0, %v411_v45  ;;  %v429_v63 = vand.u32 4294901760, %v2949_v60  ;;  %v424_v30 = vsub.f32 %v2948_v34, %v423_v31  ;;  %v441_v11 = vand.u32 4294901760, %v2950_v40  ;;  %v2951_v48 = vld [vmem:[#allocation51_spill] sm:$0xff]  ;;  %v2953_v46 = vld [vmem:[#allocation54_spill] sm:$0xff]  ;;  %v2955_v21 = vld [vmem:[#allocation56_spill] sm:$0xff] }
  0x72   :  { %1702 = vmatprep.subr.bf16.mxu0 %v2292_v59  ;;  %v435_v6 = vand.u32 4294901760, %v2951_v48  ;;  %v447_v38 = vand.u32 4294901760, %v2952_v3  ;;  %v407_v22 = vand.u32 4294901760, %v406_v52  ;;  %v2345_v32 = vpack.c.bf16 %v417_v51, %v405_v56  ;;  %v2957_v51 = vld [vmem:[#allocation60_spill] sm:$0xff] }
  0x73   :  { %v453_v59 = vand.u32 4294901760, %v2953_v46  ;;  %v465_v9 = vand.u32 4294901760, %v2954_v43  ;;  %v1523_v13 = vpack.c.bf16 %v401_v7, %v389_v8  ;;  %v419_v28 = vand.u32 4294901760, %v418_v24  ;;  %v2960_v39 = vld [vmem:[#allocation64_spill] sm:$0xff] }
  0x74   :  { %1512 = vmatpush1.bf16.msra.mxu1 %v1511_v10  ;;  %v459_v36 = vand.u32 4294901760, %v2955_v21  ;;  %v471_v14 = vand.u32 4294901760, %v2956_v25  ;;  %v413_v44 = vand.u32 4294901760, %v412_v26  ;;  %v430_v56 = vsub.f32 %v2949_v60, %v429_v63  ;;  %v2959_v60 = vld [vmem:[#allocation63_spill] sm:$0xff] }
  0x75   :  { %1704 = vmatpush1.bf16.msra.mxu0 %v2303_v20  ;;  %1514 = vmatprep.subr.bf16.mxu1 %v1513_v62  ;;  %v477_v52 = vand.u32 4294901760, %v2957_v51  ;;  %v489_v34 = vand.u32 4294901760, %v2958_v12  ;;  %v425_v0 = vand.u32 4294901760, %v424_v30  ;;  %v442_v10 = vsub.f32 %v2950_v40, %v441_v11 }
  0x76   :  { %1706 = vmatprep.subr.bf16.mxu0 %v2310_v47  ;;  %v436_v20 = vsub.f32 %v2951_v48, %v435_v6  ;;  %v448_v8 = vsub.f32 %v2952_v3, %v447_v38  ;;  %v2359_v7 = vpack.c.bf16 %v423_v31, %v411_v45  ;;  %v2361_v24 = vpack.c.bf16 %v441_v11, %v429_v63 }
  0x77   :  { %v454_v47 = vsub.f32 %v2953_v46, %v453_v59  ;;  %v466_v62 = vsub.f32 %v2954_v43, %v465_v9  ;;  %v460_v26 = vsub.f32 %v2955_v21, %v459_v36  ;;  %v472_v30 = vsub.f32 %v2956_v25, %v471_v14 }
  0x78   :  { %1516 = vmatpush1.bf16.msra.mxu1 %v1515_v37  ;;  %v483_v40 = vand.u32 4294901760, %v2959_v60  ;;  %v495_v48 = vand.u32 4294901760, %v2960_v39  ;;  %v1525_v45 = vpack.c.bf16 %v419_v28, %v407_v22  ;;  %v431_v31 = vand.u32 4294901760, %v430_v56 }
  0x79   :  { %1708 = vmatpush1.bf16.msra.mxu0 %v1707_v53  ;;  %1518 = vmatprep.subr.bf16.mxu1 %v1517_v55  ;;  %v478_v63 = vsub.f32 %v2957_v51, %v477_v52  ;;  %v490_v11 = vsub.f32 %v2958_v12, %v489_v34  ;;  %v1527_v46 = vpack.c.bf16 %v425_v0, %v413_v44  ;;  %v443_v43 = vand.u32 4294901760, %v442_v10  ;;  %v3008_v51 = vld [vmem:[#allocation74_spill] sm:$0xff]  ;;  %v3009_v12 = vld [vmem:[#allocation76_spill] sm:$0xff] }
  0x7a   :  { %1710 = vmatprep.subr.bf16.mxu0 %v1709_v2  ;;  %v437_v37 = vand.u32 4294901760, %v436_v20  ;;  %v449_v53 = vand.u32 4294901760, %v448_v8  ;;  %v2371_v3 = vpack.c.bf16 %v447_v38, %v435_v6  ;;  %v455_v21 = vand.u32 4294901760, %v454_v47  ;;  %v2962_v6 = vld [vmem:[#allocation67_spill] sm:$0xff]  ;;  %v2963_v8 = vld [vmem:[#allocation70_spill] sm:$0xff] }
  0x7b   :  { %v467_v25 = vand.u32 4294901760, %v466_v62  ;;  %v501_v41 = vand.u32 4294901760, %v2961_v54  ;;  %v461_v2 = vand.u32 4294901760, %v460_v26  ;;  %v473_v55 = vand.u32 4294901760, %v472_v30 }
  0x7c   :  { %1520 = vmatpush1.bf16.msra.mxu1 %v1519_v23  ;;  %v484_v22 = vsub.f32 %v2959_v60, %v483_v40  ;;  %v496_v28 = vsub.f32 %v2960_v39, %v495_v48  ;;  %v479_v44 = vand.u32 4294901760, %v478_v63  ;;  %v491_v0 = vand.u32 4294901760, %v490_v11  ;;  %v3011_v60 = vld [vmem:[#allocation79_spill] sm:$0xff]  ;;  %v3012_v39 = vld [vmem:[#allocation81_spill] sm:$0xff] }
  0x7d   :  { %1712 = vmatpush1.bf16.msra.mxu0 %v2329_v1  ;;  %1522 = vmatprep.subr.bf16.mxu1 %v1521_v17  ;;  %v513_v38 = vand.u32 4294901760, %v2962_v6  ;;  %v507_v56 = vand.u32 4294901760, %v2143_v29  ;;  %v1529_v10 = vpack.c.bf16 %v443_v43, %v431_v31  ;;  %v1531_v20 = vpack.c.bf16 %v449_v53, %v437_v37  ;;  %v2967_v31 = vld [vmem:[#allocation76_spill] sm:$0xff] }
  0x7e   :  { %1714 = vmatprep.subr.bf16.mxu0 %v2331_v42  ;;  %v1725_v23 = vpack.c.bf16 %v465_v9, %v453_v59  ;;  %v519_v1 = vand.u32 4294901760, %v2963_v8  ;;  %v1533_v47 = vpack.c.bf16 %v467_v25, %v455_v21  ;;  %v1727_v62 = vpack.c.bf16 %v471_v14, %v459_v36  ;;  %v2964_v21 = vld [vmem:[#allocation72_spill] sm:$0xff] }
  0x7f   :  { %v2381_v26 = vpack.c.bf16 %v489_v34, %v477_v52  ;;  %v502_v30 = vsub.f32 %v2961_v54, %v501_v41  ;;  %v1535_v42 = vpack.c.bf16 %v473_v55, %v461_v2  ;;  %v485_v17 = vand.u32 4294901760, %v484_v22 }
  0x80   :  { %1524 = vmatpush1.bf16.msra.mxu1 %v1523_v13  ;;  %v497_v63 = vand.u32 4294901760, %v496_v28  ;;  %v2385_v11 = vpack.c.bf16 %v495_v48, %v483_v40  ;;  %v1537_v59 = vpack.c.bf16 %v491_v0, %v479_v44  ;;  %v514_v43 = vsub.f32 %v2962_v6, %v513_v38  ;;  %v2965_v13 = vld [vmem:[#allocation73_spill] sm:$0xff]  ;;  %v2969_v44 = vld [vmem:[#allocation84_spill] sm:$0xff] }
  0x81   :  { %1716 = vmatpush1.bf16.msra.mxu0 %v2337_v58  ;;  %1526 = vmatprep.subr.bf16.mxu1 %v1525_v45  ;;  %v508_v9 = vsub.f32 %v2143_v29, %v507_v56  ;;  %v520_v34 = vsub.f32 %v2963_v8, %v519_v1  ;;  %v525_v36 = vand.u32 4294901760, %v2964_v21  ;;  %v537_v25 = vand.u32 4294901760, %v2965_v13  ;;  %v2966_v58 = vld [vmem:[#allocation74_spill] sm:$0xff]  ;;  %v2968_v45 = vld [vmem:[#allocation79_spill] sm:$0xff] }
  0x82   :  { %1718 = vmatprep.subr.bf16.mxu0 %v2345_v32  ;;  %v531_v14 = vand.u32 4294901760, %v2966_v58  ;;  %v503_v52 = vand.u32 4294901760, %v502_v30  ;;  %v543_v40 = vand.u32 4294901760, %v2967_v31  ;;  %v549_v48 = vand.u32 4294901760, %v2166_v15  ;;  %v2970_v30 = vld [vmem:[#allocation86_spill] sm:$0xff] }
  0x83   :  { %v561_v32 = vand.u32 4294901760, %v2968_v45  ;;  %v1539_v37 = vpack.c.bf16 %v497_v63, %v485_v17  ;;  %v2398_v53 = vpack.c.bf16 %v513_v38, %v501_v41  ;;  %v555_v2 = vand.u32 4294901760, %v2172_v16 }
  0x84   :  { %1528 = vmatpush1.bf16.msra.mxu1 %v1527_v46  ;;  %v567_v55 = vand.u32 4294901760, %v2174_v50  ;;  %v515_v22 = vand.u32 4294901760, %v514_v43  ;;  %v509_v28 = vand.u32 4294901760, %v508_v9  ;;  %v573_v0 = vand.u32 4294901760, %v2969_v44 }
  0x85   :  { %1720 = vmatpush1.bf16.msra.mxu0 %v2359_v7  ;;  %1530 = vmatprep.subr.bf16.mxu1 %v1529_v10  ;;  %v585_v8 = vand.u32 4294901760, %v2970_v30  ;;  %v521_v29 = vand.u32 4294901760, %v520_v34  ;;  %v526_v46 = vsub.f32 %v2964_v21, %v525_v36  ;;  %v538_v7 = vsub.f32 %v2965_v13, %v537_v25  ;;  %v2971_v34 = vld [vmem:[#allocation88_spill] sm:$0xff] }
  0x86   :  { %1722 = vmatprep.subr.bf16.mxu0 %v2361_v24  ;;  %v532_v41 = vsub.f32 %v2966_v58, %v531_v14  ;;  %v2408_v38 = vpack.c.bf16 %v519_v1, %v507_v56  ;;  %v544_v17 = vsub.f32 %v2967_v31, %v543_v40  ;;  %v550_v10 = vsub.f32 %v2166_v15, %v549_v48  ;;  %v2972_v31 = vld [vmem:[#allocation90_spill] sm:$0xff] }
  0x87   :  { %v562_v24 = vsub.f32 %v2968_v45, %v561_v32  ;;  %v2414_v63 = vpack.c.bf16 %v537_v25, %v525_v36  ;;  %v556_v43 = vsub.f32 %v2172_v16, %v555_v2  ;;  %v568_v9 = vsub.f32 %v2174_v50, %v567_v55 }
  0x88   :  { %1532 = vmatpush1.bf16.msra.mxu1 %v1531_v20  ;;  %v2842_v13 = vand.u32 4294901760, %v2971_v34  ;;  %v1541_v56 = vpack.c.bf16 %v515_v22, %v503_v52  ;;  %v574_v1 = vsub.f32 %v2969_v44, %v573_v0  ;;  %v586_v15 = vsub.f32 %v2970_v30, %v585_v8  ;;  %v2973_v22 = vld [vmem:[#allocation91_spill] sm:$0xff] }
  0x89   :  { %1724 = vmatpush1.bf16.msra.mxu0 %v2371_v3  ;;  %1534 = vmatprep.subr.bf16.mxu1 %v1533_v47  ;;  %v1543_v20 = vpack.c.bf16 %v521_v29, %v509_v28  ;;  %v527_v58 = vand.u32 4294901760, %v526_v46  ;;  %v539_v3 = vand.u32 4294901760, %v538_v7  ;;  %v533_v36 = vand.u32 4294901760, %v532_v41 }
  0x8a   :  { %1726 = vmatprep.subr.bf16.mxu0 %v1725_v23  ;;  %v545_v25 = vand.u32 4294901760, %v544_v17  ;;  %v2422_v21 = vpack.c.bf16 %v543_v40, %v531_v14  ;;  %v551_v16 = vand.u32 4294901760, %v550_v10  ;;  %v563_v50 = vand.u32 4294901760, %v562_v24  ;;  %v2976_v17 = vld [vmem:[#allocation97_spill] sm:$0xff] }
  0x8b   :  { %v557_v47 = vand.u32 4294901760, %v556_v43  ;;  %v569_v23 = vand.u32 4294901760, %v568_v9  ;;  %v2427_v52 = vsub.f32 %v2971_v34, %v2842_v13  ;;  %v2841_v45 = vand.u32 4294901760, %v2973_v22  ;;  %v2993_v13 = vld [vmem:[#allocation45_spill] sm:$0xff] }
  0x8c   :  { %1536 = vmatpush1.bf16.msra.mxu1 %v1535_v42  ;;  %v575_v29 = vand.u32 4294901760, %v574_v1  ;;  %v587_v28 = vand.u32 4294901760, %v586_v15  ;;  %v2974_v14 = vand.u32 4294901760, %v2972_v31  ;;  %v1545_v46 = vpack.c.bf16 %v539_v3, %v527_v58  ;;  %v2994_v3 = vld [vmem:[#allocation46_spill] sm:$0xff] }
  0x8d   :  { %1728 = vmatpush1.bf16.msra.mxu0 %v1727_v62  ;;  %1538 = vmatprep.subr.bf16.mxu1 %v1537_v59  ;;  %v2975_v62 = vld [vmem:[#allocation95_spill] sm:$0xff]  ;;  %v1741_v7 = vpack.c.bf16 %v561_v32, %v549_v48  ;;  %v2839_v41 = vand.u32 4294901760, %v2223_v18  ;;  %v2838_v10 = vand.u32 4294901760, %v2976_v17  ;;  %v1547_v24 = vpack.c.bf16 %v545_v25, %v533_v36 }
  0x8e   :  { %1730 = vmatprep.subr.bf16.mxu0 %v2381_v26  ;;  %v2434_v40 = vsub.f32 %v2972_v31, %v2974_v14  ;;  %v2840_v42 = vand.u32 4294901760, %v2975_v62  ;;  %v2439_v43 = vpack.c.bf16 %v567_v55, %v555_v2  ;;  %v2441_v59 = vpack.c.bf16 %v585_v8, %v573_v0  ;;  %v2977_v26 = vld [vmem:[#allocation98_spill] sm:$0xff]  ;;  %v2979_v2 = vld [vmem:[#allocation23_spill] sm:$0xff]  ;;  %v2980_v55 = vld [vmem:[#allocation24_spill] sm:$0xff] }
  0x8f   :  { %v2837_v15 = vand.u32 4294901760, %v2977_v26  ;;  %v1549_v9 = vpack.c.bf16 %v563_v50, %v551_v16  ;;  %v1551_v1 = vpack.c.bf16 %v569_v23, %v557_v47  ;;  %v581_v14 = vand.u32 4294901760, %v2427_v52  ;;  %v2989_v23 = vld [vmem:[#allocation100_spill] sm:$0xff]  ;;  %v3004_v0 = vld [vmem:[#allocation69_spill] sm:$0xff]  ;;  %v3013_v47 = vld [vmem:[#allocation82_spill] sm:$0xff] }
  0x90   :  { %1540 = vmatpush1.bf16.msra.mxu1 %v1539_v37  ;;  %v2449_v58 = vsub.f32 %v2973_v22, %v2841_v45  ;;  %v1553_v48 = vpack.c.bf16 %v587_v28, %v575_v29  ;;  %v593_v8 = vand.u32 4294901760, %v2434_v40  ;;  %v610_v32 = vsub.f32 %v2975_v62, %v2840_v42  ;;  %v2978_v37 = vld [vmem:[#allocation22_spill] sm:$0xff]  ;;  %v2990_v40 = vld [vmem:[#allocation39_spill] sm:$0xff]  ;;  %v3006_v29 = vld [vmem:[#allocation72_spill] sm:$0xff] }
  0x91   :  { %1732 = vmatpush1.bf16.msra.mxu0 %v2385_v11  ;;  %1542 = vmatprep.subr.bf16.mxu1 %v1541_v56  ;;  %v2843_v16 = vand.u32 4294901760, %v2245_v19  ;;  %v2460_v50 = vsub.f32 %v2223_v18, %v2839_v41  ;;  %v616_v11 = vsub.f32 %v2976_v17, %v2838_v10  ;;  %v2472_v56 = vsub.f32 %v2977_v26, %v2837_v15  ;;  %v2991_v42 = vld [vmem:[#allocation42_spill] sm:$0xff]  ;;  %v2992_v15 = vld [vmem:[#allocation43_spill] sm:$0xff]  ;;  %v2995_v10 = vld [vmem:[#allocation48_spill] sm:$0xff] }
  0x92   :  { %1734 = vmatprep.subr.bf16.mxu0 %v2398_v53  ;;  %v599_v52 = vand.u32 4294901760, %v2449_v58  ;;  %v3005_v53 = vld [vmem:[#allocation70_spill] sm:$0xff]  ;;  %v3007_v28 = vld [vmem:[#allocation73_spill] sm:$0xff]  ;;  %v611_v36 = vand.u32 4294901760, %v610_v32  ;;  %v1555_v32 = vpack.c.bf16 %v593_v8, %v581_v14  ;;  %v3014_v45 = vand.u32 4294901760, %v2971_v34 }
  0x93   :  { %v617_v25 = vand.u32 4294901760, %v616_v11  ;;  %v3016_v8 = vand.u32 4294901760, %v2973_v22  ;;  %v3019_v11 = vand.u32 4294901760, %v2976_v17 }
  0x94   :  { %1544 = vmatpush1.bf16.msra.mxu1 %v1543_v20  ;;  %v634_v20 = vsub.f32 %v2245_v19, %v2843_v16 }
  0x95   :  { %1736 = vmatpush1.bf16.msra.mxu0 %v2408_v38  ;;  %1546 = vmatprep.subr.bf16.mxu1 %v1545_v46  ;;  %v627_v38 = vand.u32 4294901760, %v2989_v23  ;;  %v3003_v46 = vld [vmem:[#allocation102_spill] sm:$0xff] }
  0x96   :  { %1738 = vmatprep.subr.bf16.mxu0 %v2414_v63  ;;  %v2996_v63 = vld [vmem:[#allocation49_spill] sm:$0xff]  ;;  %v639_v41 = vand.u32 4294901760, %v3003_v46  ;;  %v635_v16 = vand.u32 4294901760, %v634_v20  ;;  %v3023_v20 = vld [vmem:[#allocation19_spill] sm:$0xff] }
  0x98   :  { %1548 = vmatpush1.bf16.msra.mxu1 %v1547_v24  ;;  %v3010_v24 = vld [vmem:[#allocation78_spill] sm:$0xff]  ;;  %v640_v14 = vsub.f32 %v3003_v46, %v639_v41 }
  0x99   :  { %1740 = vmatpush1.bf16.msra.mxu0 %v2422_v21  ;;  %1550 = vmatprep.subr.bf16.mxu1 %v1549_v9  ;;  %v3015_v21 = vand.u32 4294901760, %v2972_v31  ;;  %v605_v9 = vand.u32 4294901760, %v2460_v50  ;;  %v3018_v50 = vand.u32 4294901760, %v2223_v18 }
  0x9a   :  { %1742 = vmatprep.subr.bf16.mxu0 %v1741_v7  ;;  %v628_v7 = vsub.f32 %v2989_v23, %v627_v38  ;;  %v641_v46 = vand.u32 4294901760, %v640_v14  ;;  %v3027_v14 = vld [vmem:[#allocation85_spill] sm:$0xff] }
  0x9b   :  { %v1747_v27 = vpack.c.bf16 %v3015_v21, %v3014_v45  ;;  %v1557_v45 = vpack.c.bf16 %v611_v36, %v599_v52  ;;  %v3017_v21 = vand.u32 4294901760, %v2975_v62  ;;  %v1751_v23 = vpack.c.bf16 %v3019_v11, %v3018_v50  ;;  %v3036_v50 = vld [vmem:[#allocation15_spill] sm:$0xff]  ;;  %v3039_v11 = vld [vmem:[#allocation28_spill] sm:$0xff] }
  0x9c   :  { %1552 = vmatpush1.bf16.msra.mxu1 %v1551_v1  ;;  %v623_v1 = vand.u32 4294901760, %v2472_v56  ;;  %v3020_v36 = vand.u32 4294901760, %v2977_v26  ;;  %v3021_v52 = vand.u32 4294901760, %v2245_v19 }
  0x9d   :  { %1744 = vmatpush1.bf16.msra.mxu0 %v2439_v43  ;;  %1554 = vmatprep.subr.bf16.mxu1 %v1553_v48  ;;  %v1749_v58 = vpack.c.bf16 %v3017_v21, %v3016_v8  ;;  %v1559_v43 = vpack.c.bf16 %v617_v25, %v605_v9  ;;  %v629_v48 = vand.u32 4294901760, %v628_v7  ;;  %v3022_v25 = vld [vmem:[#allocation17_spill] sm:$0xff]  ;;  %v3024_v7 = vld [vmem:[#allocation20_spill] sm:$0xff]  ;;  %v3033_v21 = vpack.c.bf16 %v2980_v55, %v2979_v2  ;;  %v3042_v2 = vld [vmem:[#allocation18_spill] sm:$0xff] }
  0x9e   :  { %1746 = vmatprep.subr.bf16.mxu0 %v2441_v59  ;;  %v1561_v59 = vpack.c.bf16 %v635_v16, %v623_v1  ;;  %v1753_v8 = vpack.c.bf16 %v3021_v52, %v3020_v36  ;;  %v1565_v9 = vpack.c.bf16 %v3023_v20, %v3022_v25  ;;  %v3026_v16 = vld [vmem:[#allocation11_spill] sm:$0xff]  ;;  %v3034_v1 = vld [vmem:[#allocation14_spill] sm:$0xff]  ;;  %v3044_v36 = vld [vmem:[#allocation29_spill] sm:$0xff] }
  0x9f   :  { %v1563_v56 = vpack.c.bf16 %v641_v46, %v629_v48  ;;  %v3031_v46 = vld [vmem:[#allocation92_spill] sm:$0xff]  ;;  %v3040_v48 = vld [vmem:[#allocation27_spill] sm:$0xff]  ;;  %v3043_v55 = vld [vmem:[#allocation30_spill] sm:$0xff] }
  0xa0   :  { %1556 = vmatpush1.bf16.msra.mxu1 %v1555_v32  ;;  %v3025_v32 = vld [vmem:[#allocation21_spill] sm:$0xff]  ;;  %v3045_v52 = vpack.c.bf16 %v3043_v55, %v3044_v36  ;;  %v3054_v20 = vld [vmem:[#allocation32_spill] sm:$0xff]  ;;  %v3085_v36 = vld [vmem:[#allocation62_spill] sm:$0xff] }
  0xa1   :  { %1748 = vmatpush1.bf16.msra.mxu0 %v1747_v27  ;;  %1558 = vmatprep.subr.bf16.mxu1 %v1557_v45  ;;  %v1755_v27 = vpack.c.bf16 %v639_v41, %v627_v38  ;;  %v3029_v41 = vpack.c.bf16 %v2978_v37, %v2005_v49  ;;  %v3030_v38 = vld [vmem:[#allocation13_spill] sm:$0xff]  ;;  %v3037_v49 = vpack.c.bf16 %v2029_v5, %v2026_v4  ;;  %v3038_v37 = vld [vmem:[#allocation16_spill] sm:$0xff]  ;;  %v3050_v4 = vld [vmem:[#allocation26_spill] sm:$0xff] }
  0xa2   :  { %1750 = vmatprep.subr.bf16.mxu0 %v1749_v58  ;;  %v1567_v58 = vpack.c.bf16 %v3025_v32, %v3024_v7  ;;  %v3032_v45 = vld [vmem:[#allocation89_spill] sm:$0xff]  ;;  %v3051_v5 = vld [vmem:[#allocation36_spill] sm:$0xff]  ;;  %v3057_v32 = vld [vmem:[#allocation35_spill] sm:$0xff] }
  0xa4   :  { %1560 = vmatpush1.bf16.msra.mxu1 %v1559_v43  ;;  %v3035_v43 = vpack.c.bf16 %v2019_v61, %v2013_v57  ;;  %v3046_v57 = vld [vmem:[#allocation25_spill] sm:$0xff] }
  0xa5   :  { %1752 = vmatpush1.bf16.msra.mxu0 %v1751_v23  ;;  %1562 = vmatprep.subr.bf16.mxu1 %v1561_v59  ;;  %v3028_v23 = vld [vmem:[#allocation12_spill] sm:$0xff]  ;;  %v3041_v59 = vpack.c.bf16 %v3039_v11, %v3040_v48  ;;  %v3047_v61 = vld [vmem:[#allocation33_spill] sm:$0xff]  ;;  %v3081_v48 = vld [vmem:[#allocation59_spill] sm:$0xff] }
  0xa6   :  { %1754 = vmatprep.subr.bf16.mxu0 %v1753_v8  ;;  %v3048_v8 = vld [vmem:[#allocation31_spill] sm:$0xff] }
  0xa8   :  { %1564 = vmatpush1.bf16.msra.mxu1 %v1563_v56  ;;  %v3049_v56 = vpack.c.bf16 %v3047_v61, %v3048_v8  ;;  %v3088_v61 = vpack.c.bf16 %v3005_v53, %v3004_v0  ;;  %v3089_v8 = vld [vmem:[#allocation68_spill] sm:$0xff]  ;;  %v3095_v53 = vld [vmem:[#allocation77_spill] sm:$0xff]  ;;  %v3096_v0 = vpack.c.bf16 %v3013_v47, %v3012_v39  ;;  %v3103_v39 = vld [vmem:[#allocation94_spill] sm:$0xff]  ;;  %v3104_v47 = vpack.c.bf16 %v2976_v17, %v2223_v18 }
  0xa9   :  { %1756 = vmatpush1.bf16.msra.mxu0 %v1755_v27  ;;  %1566 = vmatprep.subr.bf16.mxu1 %v1565_v9  ;;  %v3052_v27 = vld [vmem:[#allocation34_spill] sm:$0xff]  ;;  %v3055_v9 = vld [vmem:[#allocation37_spill] sm:$0xff]  ;;  %v1913_v18 = vmov 1966171168  }
  0xaa   :  { %1758 = vmatprep.subr.bf16.mxu0 %v3026_v16  ;;  %v3053_v25 = vpack.c.bf16 %v3051_v5, %v3052_v27  ;;  %v3056_v7 = vpack.c.bf16 %v2059_v33, %v3055_v9  ;;  %v3059_v16 = vld [vmem:[#allocation38_spill] sm:$0xff]  ;;  %v3063_v33 = vld [vmem:[#allocation44_spill] sm:$0xff]  ;;  %v3092_v5 = vpack.c.bf16 %v3009_v12, %v3008_v51  ;;  %v3099_v12 = vld [vmem:[#allocation83_spill] sm:$0xff]  ;;  %v3100_v51 = vpack.c.bf16 %v2972_v31, %v2971_v34 }
  0xab   :  { %646 = vmatmul.mubr.f32.vlgmr.msra.gmra.mrb[0].mxu1 %v3027_v14  ;;  %v3107_v31 = vld [vmem:[#allocation99_spill] sm:$0xff]  ;;  %v3108_v34 = vld [vmem:[#allocation102_spill] sm:$0xff]  ;;  %v3109_v27 = vld [vmem:[#allocation100_spill] sm:$0xff]  ;;  %v1402_v17 = vunpack.c.l.s4 %v1913_v18 }
  0xac   :  { %1255 = vmatmul.mubr.f32.vlgmr.msra.gmra.mrb[0].mxu0 %v3027_v14  ;;  %1568 = vmatpush1.bf16.msra.mxu1 %v1567_v58  ;;  %v3058_v58 = vpack.c.bf16 %v2990_v40, %v2061_v35  ;;  %v3065_v35 = vld [vmem:[#allocation47_spill] sm:$0xff]  ;;  %v3066_v40 = vld [vmem:[#allocation52_spill] sm:$0xff] }
  0xad   :  { %1760 = vmatpush1.bf16.msra.mxu0 %v3028_v23  ;;  %1570 = vmatprep.subr.bf16.mxu1 %v3029_v41  ;;  %v3060_v23 = vpack.c.bf16 %v2992_v15, %v2991_v42  ;;  %v3061_v41 = vld [vmem:[#allocation40_spill] sm:$0xff]  ;;  %v3069_v42 = vld [vmem:[#allocation50_spill] sm:$0xff]  ;;  %v3070_v15 = vld [vmem:[#allocation55_spill] sm:$0xff] }
  0xae   :  { %1762 = vmatprep.subr.bf16.mxu0 %v3030_v38  ;;  %846 = vmatprep.mubr.f32.mxu1 %v3031_v46  ;;  %v3062_v38 = vpack.c.bf16 %v2994_v3, %v2993_v13  ;;  %v3064_v46 = vpack.c.bf16 %v2996_v63, %v2995_v10  ;;  %v3073_v13 = vld [vmem:[#allocation53_spill] sm:$0xff]  ;;  %v3074_v3 = vld [vmem:[#allocation58_spill] sm:$0xff] }
  0xaf   :  { %1390 = vmatprep.mubr.f32.mxu0 %v3032_v45  ;;  %v3067_v45 = vld [vmem:[#allocation51_spill] sm:$0xff]  ;;  %v3077_v10 = vld [vmem:[#allocation57_spill] sm:$0xff] }
  0xb0   :  { %1572 = vmatpush1.bf16.msra.mxu1 %v3033_v21  ;;  %v3068_v21 = vpack.c.bf16 %v3066_v40, %v3067_v45  ;;  %v3078_v63 = vld [vmem:[#allocation61_spill] sm:$0xff] }
  0xb1   :  { %1764 = vmatpush1.bf16.msra.mxu0 %v3034_v1  ;;  %1574 = vmatprep.subr.bf16.mxu1 %v3035_v43  ;;  %v3071_v1 = vld [vmem:[#allocation54_spill] sm:$0xff] }
  0xb2   :  { %1766 = vmatprep.subr.bf16.mxu0 %v3036_v50  ;;  %v3072_v43 = vpack.c.bf16 %v3070_v15, %v3071_v1  ;;  %v3075_v50 = vld [vmem:[#allocation56_spill] sm:$0xff] }
  0xb4   :  { %1576 = vmatpush1.bf16.msra.mxu1 %v3037_v49  ;;  %v3076_v49 = vpack.c.bf16 %v3074_v3, %v3075_v50 }
  0xb5   :  { %1768 = vmatpush1.bf16.msra.mxu0 %v3038_v37  ;;  %1578 = vmatprep.subr.bf16.mxu1 %v3041_v59  ;;  %v3079_v37 = vld [vmem:[#allocation60_spill] sm:$0xff] }
  0xb6   :  { %1770 = vmatprep.subr.bf16.mxu0 %v3042_v2  ;;  %v3080_v11 = vpack.c.bf16 %v3078_v63, %v3079_v37  ;;  %v3082_v59 = vld [vmem:[#allocation64_spill] sm:$0xff]  ;;  %v3083_v2 = vld [vmem:[#allocation63_spill] sm:$0xff] }
  0xb7   :  { %v3084_v55 = vpack.c.bf16 %v3082_v59, %v3083_v2 }
  0xb8   :  { %1580 = vmatpush1.bf16.msra.mxu1 %v3045_v52  ;;  %v3086_v52 = vpack.c.bf16 %v2962_v6, %v2961_v54  ;;  %v3093_v54 = vld [vmem:[#allocation75_spill] sm:$0xff]  ;;  %v3094_v6 = vpack.c.bf16 %v3011_v60, %v3010_v24  ;;  %v3102_v24 = vpack.c.bf16 %v2975_v62, %v2973_v22  ;;  %v3111_v22 = vld [vmem:[#allocation101_spill] sm:$0xff] }
  0xb9   :  { %1772 = vmatpush1.bf16.msra.mxu0 %v3046_v57  ;;  %1582 = vmatprep.subr.bf16.mxu1 %v3049_v56  ;;  %v3087_v57 = vld [vmem:[#allocation65_spill] sm:$0xff]  ;;  %v3090_v56 = vpack.c.bf16 %v3007_v28, %v3006_v29  ;;  %v3097_v29 = vld [vmem:[#allocation80_spill] sm:$0xff]  ;;  %v3098_v28 = vpack.c.bf16 %v2970_v30, %v2969_v44  ;;  %v3101_v60 = vld [vmem:[#allocation87_spill] sm:$0xff]  ;;  %v3106_v30 = vpack.c.bf16 %v2245_v19, %v2977_v26 }
  0xba   :  { %1774 = vmatprep.subr.bf16.mxu0 %v3050_v4  ;;  %v3091_v4 = vld [vmem:[#allocation71_spill] sm:$0xff]  ;;  %v3105_v44 = vld [vmem:[#allocation96_spill] sm:$0xff]  ;;  %v3112_v62 = vld [vmem:[#allocation93_spill] sm:$0xff] }
  0xbc   :  { %1584 = vmatpush1.bf16.msra.mxu1 %v3053_v25  ;;  %v3110_v25 = vpack.c.bf16 %v3108_v34, %v3109_v27 }
  0xbd   :  { %1776 = vmatpush1.bf16.msra.mxu0 %v3054_v20  ;;  %1586 = vmatprep.subr.bf16.mxu1 %v3056_v7  ;;  %v1403_v20 = vunpack.c.0.s8 %v1402_v17 }
  0xbe   :  { %1778 = vmatprep.subr.bf16.mxu0 %v3057_v32 }
  0xc0   :  { %1588 = vmatpush1.bf16.msra.mxu1 %v3058_v58 }
  0xc1   :  { %1780 = vmatpush1.bf16.msra.mxu0 %v3059_v16  ;;  %1590 = vmatprep.subr.bf16.mxu1 %v3060_v23  ;;  %v3113_v16 = vld [vmem:[#allocation41_spill] sm:$0xff] }
  0xc2   :  { %1782 = vmatprep.subr.bf16.mxu0 %v3061_v41  ;;  %v1406_v23 = vsub.s32 %v1403_v20, %v3113_v16 }
  0xc4   :  { %1592 = vmatpush1.bf16.msra.mxu1 %v3062_v38 }
  0xc5   :  { %1784 = vmatpush1.bf16.msra.mxu0 %v3063_v33  ;;  %1594 = vmatprep.subr.bf16.mxu1 %v3064_v46  ;;  %v3114_v33 = vlaneseq }
  0xc6   :  { %1786 = vmatprep.subr.bf16.mxu0 %v3065_v35 }
  0xc7   :  { %vm1418_vm0 = vcmp.lt.s32.totalorder %v3114_v33, 256 }
  0xc8   :  { %1596 = vmatpush1.bf16.msra.mxu1 %v3068_v21 }
  0xc9   :  { %1788 = vmatpush1.bf16.msra.mxu0 %v3069_v42  ;;  %1598 = vmatprep.subr.bf16.mxu1 %v3072_v43 }
  0xca   :  { %1790 = vmatprep.subr.bf16.mxu0 %v3073_v13 }
  0xcc   :  { %1600 = vmatpush1.bf16.msra.mxu1 %v3076_v49 }
  0xcd   :  { %1792 = vmatpush1.bf16.msra.mxu0 %v3077_v10  ;;  %1602 = vmatprep.subr.bf16.mxu1 %v3080_v11 }
  0xce   :  { %1794 = vmatprep.subr.bf16.mxu0 %v3081_v48 }
  0xd0   :  { %1604 = vmatpush1.bf16.msra.mxu1 %v3084_v55 }
  0xd1   :  { %1796 = vmatpush1.bf16.msra.mxu0 %v3085_v36  ;;  %1606 = vmatprep.subr.bf16.mxu1 %v3086_v52 }
  0xd2   :  { %1798 = vmatprep.subr.bf16.mxu0 %v3087_v57 }
  0xd4   :  { %1608 = vmatpush1.bf16.msra.mxu1 %v3088_v61 }
  0xd5   :  { %1800 = vmatpush1.bf16.msra.mxu0 %v3089_v8  ;;  %1610 = vmatprep.subr.bf16.mxu1 %v3090_v56 }
  0xd6   :  { %1802 = vmatprep.subr.bf16.mxu0 %v3091_v4 }
  0xd8   :  { %1612 = vmatpush1.bf16.msra.mxu1 %v3092_v5 }
  0xd9   :  { %1804 = vmatpush1.bf16.msra.mxu0 %v3093_v54  ;;  %1614 = vmatprep.subr.bf16.mxu1 %v3094_v6 }
  0xda   :  { %1806 = vmatprep.subr.bf16.mxu0 %v3095_v53 }
  0xdc   :  { %1616 = vmatpush1.bf16.msra.mxu1 %v3096_v0 }
  0xdd   :  { %1808 = vmatpush1.bf16.msra.mxu0 %v3097_v29  ;;  %1618 = vmatprep.subr.bf16.mxu1 %v3098_v28 }
  0xde   :  { %1810 = vmatprep.subr.bf16.mxu0 %v3099_v12 }
  0xe0   :  { %1620 = vmatpush1.bf16.msra.mxu1 %v3100_v51 }
  0xe1   :  { %1812 = vmatpush1.bf16.msra.mxu0 %v3101_v60  ;;  %1622 = vmatprep.subr.bf16.mxu1 %v3102_v24 }
  0xe2   :  { %1814 = vmatprep.subr.bf16.mxu0 %v3103_v39 }
  0xe4   :  { %1624 = vmatpush1.bf16.msra.mxu1 %v3104_v47 }
  0xe5   :  { %1816 = vmatpush1.bf16.msra.mxu0 %v3105_v44  ;;  %1626 = vmatprep.subr.bf16.mxu1 %v3106_v30 }
  0xe6   :  { %1818 = vmatprep.subr.bf16.mxu0 %v3107_v31 }
  0xe8   :  { %1628 = vmatpush1.bf16.msra.mxu1 %v3110_v25 }
  0xe9   :  { %1820 = vmatpush1.bf16.msra.mxu0 %v3111_v22 }
  0xeb   :  { %849 = vmatmul.mubr.f32.vlgmr.msra.gmra.mrb[0].mxu1 %v3112_v62 }
  0xec   :  { %1392 = vmatmul.mubr.f32.vlgmr.msra.gmra.mrb[0].mxu0 %v3027_v14 }
 0x1be   :  { %v850_v9 = vpop.f32.mrb[0].mxu1 }
 0x1bf   :  { %v1393_v7 = vpop.f32.mrb[0].mxu0  ;;  %v852_v19 = vpop.f32.mrb[1].mxu1 }
 0x1c0   :  { %v1821_v32 = vadd.f32 %v1393_v7, %v850_v9  ;;  %v1395_v26 = vpop.f32.mrb[1].mxu0 }
 0x1c1   :  { %v1822_v58 = vadd.f32 %v1395_v26, %v852_v19 }
 0x1c3   :  { %v1400_v41 = vcombine.low %v1821_v32, %v1822_v58 }
 0x1c5   :  { %v1407_v38 = vrot.slane %v1400_v41, %v1406_v23 }
 0x1c7   :  { %v1414_v46 = vrot.slane %v1407_v38, %v1406_v23 }
 0x1c9   :  { %1420 = vst.msk [vmem:[#allocation7] sm:$0x3] %vm1418_vm0, %v1414_v46 }
 0x1ca   :  { %1892 = shalt.err (!%p1889_p6)
}
 0x1cb   :  { %s1893_s10 = scalar_lea.hbm %s2709_s2, 32 }
 0x1cc   :  { %p1894_p7 = scmp.ne.s32.totalorder %s2709_s2, %s1893_s10  ;;  %p1897_p8 = scmp.lt.u32.totalorder %s1893_s10, %s2709_s2 }
 0x1ce   :  { %p1899_p9 = pnand %p1897_p8, %p1894_p7 }
 0x1d0   :  { %1902 = shalt.err (!%p1899_p9)
}
 0x1d1   :  { %1430 = dma.vmem_to_hbm [thread:$0]  %s1428_s6, 32, %s2709_s2, [#allocation4]  }
 0x1d2   :  { %1907 = dma.done.wait [#allocation4], 32  }
 0x1d3   :  { %1908 = vsyncadd [#allocation4], 4294967264 }
 0x1d4   :  { %1434 = vsyncpa [#allocation3], 1 }
 0x1d5   :  { %1435 = vsyncpa [#allocation6], 1 }
 0x1d6   :  { %1436 = vsyncpa [#allocation4], 1 }

</bundles_post_ra>
